<compile_context>
chip_gen: v6e
topology: v6e:2x2x1
jax: 0.10.0
libtpu: 0.0.40
codegen_flags: <defaults>
</compile_context>

<pallas_src>
import math

import jax
import jax.numpy as jnp
from jax.experimental import pallas as pl
from jax.experimental.pallas import tpu as pltpu


# ---------------------------------------------------------------------------
# Kernels
# ---------------------------------------------------------------------------
def _store_folded(ctx_ref, parts, dv, use_concat):
    """Store per-head (tq, Dv) results as one lane-folded (tq, nh*Dv) slab.

    Preferred: a single concatenated store (lane-dense, unmasked vst).
    Fallback: per-head static slice stores (same dense HBM layout; only the
    vst into the VMEM block stays lane-masked)."""
    if len(parts) == 1:
        ctx_ref[0, 0] = parts[0].astype(ctx_ref.dtype)
    elif use_concat:
        ctx_ref[0, 0] = jnp.concatenate(parts, axis=-1).astype(ctx_ref.dtype)
    else:
        for h, part in enumerate(parts):
            ctx_ref[0, 0, :, h * dv:(h + 1) * dv] = part.astype(ctx_ref.dtype)


def _make_dense_kernel(nh, dv, write_attn, use_concat):
    """Full-Lk kernel: softmax over the whole key axis in one grid step; can
    also emit the Lq x Lk attention matrix."""

    def kernel(q_ref, k_ref, v_ref, mask_ref, ctx_ref, *rest):
        q = q_ref[0]          # (nh, tq, Dk)
        k = k_ref[0]          # (nh, Lk, Dk)
        v = v_ref[0]          # (nh, Lk, Dv)
        m = mask_ref[0]       # (1 | nh, tq, Lk); nonzero == masked

        # Fold 1/sqrt(d_k) into Q: Lq*Dk multiplies instead of Lq*Lk.
        qs = q * (1.0 / math.sqrt(q.shape[-1]))

        # Q @ K^T as a direct contraction over Dk (dot_general with a
        # transposed-RHS MXU push; no K^T materialization).
        # TODO(synk): confirm with pl.lower_as_mlir that no vxpose of K is
        # emitted on the target generation; if it is, pre-layout K as
        # [B,H,Dk,Lk] in the wrapper.
        scores = jnp.einsum("hqd,hkd->hqk", qs, k,
                            preferred_element_type=jnp.float32)

        # masked_fill_(attn_mask, -1e9); broadcasts over heads for a
        # [B,1,Lq,Lk] padding mask.  Kept as where() (not an additive bias) so
        # fully-masked rows keep the module's uniform-softmax behaviour.
        scores = jnp.where(m != 0, jnp.float32(-1e9), scores)

        # Numerically stable softmax in f32; denominator reciprocal on the EUP.
        # TODO(synk): optional bf16 exp/mul path for v6e/v7x behind a numerics
        # flag (the softmax elementwise chain is the binding slot at Dk<=64).
        scores = scores - jnp.max(scores, axis=-1, keepdims=True)
        e = jnp.exp(scores)
        denom = jnp.sum(e, axis=-1, keepdims=True)
        attn = e * pl.reciprocal(denom, approx=True)

        # Per-head PV matmuls (f32 accumulation), folded along the lane axis
        # so the context store is a lane-dense (tq, nh*Dv) slab.
        p = attn.astype(v.dtype)
        parts = [jnp.dot(p[h], v[h], preferred_element_type=jnp.float32)
                 for h in range(nh)]
        _store_folded(ctx_ref, parts, dv, use_concat)

        if write_attn:
            attn_ref = rest[0]
            attn_ref[0] = attn.astype(attn_ref.dtype)

    return kernel


def _make_flash_kernel(nh, dv, use_concat):
    """Lk-tiled online-softmax kernel (context only): grid axis 3 walks the
    key tiles with running max / sum / accumulator in VMEM scratch."""

    def kernel(q_ref, k_ref, v_ref, mask_ref, ctx_ref, m_sc, l_sc, acc_sc):
        ki = pl.program_id(3)

        @pl.when(ki == 0)
        def _():
            m_sc[...] = jnp.full(m_sc.shape, -jnp.inf, dtype=m_sc.dtype)
            l_sc[...] = jnp.zeros(l_sc.shape, dtype=l_sc.dtype)
            acc_sc[...] = jnp.zeros(acc_sc.shape, dtype=acc_sc.dtype)

        q = q_ref[0]          # (nh, tq, Dk)
        k = k_ref[0]          # (nh, tk, Dk)
        v = v_ref[0]          # (nh, tk, Dv)
        m = mask_ref[0]       # (1 | nh, tq, tk)

        qs = q * (1.0 / math.sqrt(q.shape[-1]))
        s = jnp.einsum("hqd,hkd->hqk", qs, k,
                       preferred_element_type=jnp.float32)
        s = jnp.where(m != 0, jnp.float32(-1e9), s)

        m_prev = m_sc[...]                                    # (nh, tq, 1)
        m_new = jnp.maximum(m_prev, jnp.max(s, axis=-1, keepdims=True))
        alpha = jnp.exp(m_prev - m_new)
        p = jnp.exp(s - m_new)
        l_sc[...] = alpha * l_sc[...] + jnp.sum(p, axis=-1, keepdims=True)
        m_sc[...] = m_new

        pv = jnp.einsum("hqk,hkd->hqd", p.astype(v.dtype), v,
                        preferred_element_type=jnp.float32)
        acc_sc[...] = alpha * acc_sc[...] + pv

        @pl.when(ki == pl.num_programs(3) - 1)
        def _():
            # TODO(synk): rows masked at *every* key position differ slightly
            # from the module here (module yields a uniform softmax).
            out = acc_sc[...] * pl.reciprocal(l_sc[...], approx=True)
            _store_folded(ctx_ref, [out[h] for h in range(nh)], dv, use_concat)

    return kernel


# ---------------------------------------------------------------------------
# Generation-aware tiling / VMEM budgets
# ---------------------------------------------------------------------------
def _round_up(x, m):
    return ((x + m - 1) // m) * m


def _vmem_capacity_bytes():
    try:
        info = pltpu.get_tpu_info()
        for attr in ("vmem_capacity_bytes", "vmem_size_bytes", "vmem_bytes"):
            v = getattr(info, attr, None)
            if v:
                return int(v)
    except Exception:
        pass
    return 128 * 1024 * 1024   # v4/v5e/v6e-class default


def _generation_params():
    """v5e/v6e (128 MiB VMEM): big tiles, ~96 MiB scoped limit, q-tile axis
    parallel.  v7x (64 MiB): ~3/4-of-physical limit, smaller tiles, q-tile
    axis "arbitrary" so megacore sharding lands on B/H and both TensorCores do
    not re-DMA the same K/V blocks."""
    cap = _vmem_capacity_bytes()
    if cap >= 100 * 1024 * 1024:
        return dict(vmem_limit=min(100 * 1024 * 1024, (3 * cap) // 4),
                    work_budget=36 * 1024 * 1024,
                    tq_cap=512, qi_parallel=True)
    return dict(vmem_limit=(3 * cap) // 4,
                work_budget=max(8 * 1024 * 1024, cap // 4),
                tq_cap=256, qi_parallel=False)


def _choose_q_tiling(lq, cap):
    """Return (tq, lq_padded).  Lq is always padded to a multiple of the tile
    (masked tail sliced off in the wrapper) -- never a whole-Lq fallback."""
    if lq <= cap:
        t = _round_up(max(lq, 8), 8)
        return t, t
    for t in (512, 384, 256, 128):
        if t <= cap and lq % t == 0:
            return t, lq
    return 128, _round_up(lq, 128)


def _per_step_bytes(nh, tq, lk_blk, dk, dv, elem, write_attn):
    """Per-grid-step VMEM footprint: x2 double-buffered in/out blocks plus the
    f32 score/exp/prob intermediates and the f32 context accumulator."""
    io = 2 * elem * nh * (tq * dk + lk_blk * (dk + dv))      # Q, K, V blocks
    io += 2 * 4 * nh * tq * lk_blk                            # mask (<= int32)
    io += 2 * elem * nh * tq * dv                             # ctx block
    if write_attn:
        io += 2 * elem * nh * tq * lk_blk                     # attn block
    interm = nh * 3 * 4 * tq * lk_blk + 4 * nh * tq * dv
    return io + interm


def _pick_heads_per_step(h, tq, lk_blk, dk, dv, elem, write_attn, budget):
    """Largest divisor of H whose working set fits the budget: amortizes the
    ~0.35us grid-step overhead and widens the lane-folded ctx block (nh*Dv)
    toward >=128 lanes."""
    best = 1
    for cand in range(1, h + 1):
        if h % cand == 0 and _per_step_bytes(cand, tq, lk_blk, dk, dv, elem,
                                             write_attn) <= budget:
            best = cand
    return best


# ---------------------------------------------------------------------------
# Wrapper
# ---------------------------------------------------------------------------
def scaled_dot_product_attention(Q, K, V, attn_mask, *, return_attn=True,
                                 lk_tile=None):
    """Q:[B,H,Lq,Dk], K:[B,H,Lk,Dk], V:[B,H,Lk,Dv].
    attn_mask: [B,H,Lq,Lk] or [B,1,Lq,Lk]; True/nonzero == masked.
    Returns (context [B,H,Lq,Dv], attn [B,H,Lq,Lk] or None)."""
    B, H, Lq, Dk = Q.shape
    Lk = K.shape[2]
    Dv = V.shape[3]
    Hm = attn_mask.shape[1]
    assert Hm in (1, H), "attn_mask heads must be 1 (broadcast) or H"

    gen = _generation_params()
    elem = jnp.dtype(Q.dtype).itemsize
    tq, lq_pad = _choose_q_tiling(Lq, gen["tq_cap"])

    # Lk tiling (online softmax) only when the attention matrix isn't needed.
    flash, tk = False, Lk
    if not return_attn:
        if lk_tile is not None:
            flash, tk = True, int(lk_tile)
        elif _per_step_bytes(1, tq, Lk, Dk, Dv, elem, False) > gen["work_budget"]:
            flash, tk = True, 128
            for cand in (1024, 512, 256):
                if _per_step_bytes(1, tq, cand, Dk, Dv, elem,
                                   False) <= gen["work_budget"]:
                    tk = cand
                    break
    if not flash:
        # Safety net: shrink the q-tile (not below 128) if even one head's
        # full-Lk working set overflows the budget (long Lk, return_attn=True).
        while tq >= 256 and _per_step_bytes(1, tq, Lk, Dk, Dv, elem,
                                            return_attn) > gen["work_budget"]:
            tq //= 2

    # int8 mask only when the q-tile respects the int8 (32,128) min tile.
    mask_dtype = jnp.int8 if tq >= 32 else jnp.int32
    mask = attn_mask.astype(mask_dtype)

    # Pad Lq to a multiple of tq (unmasked rows) and, for the Lk-tiled path,
    # Lk to a multiple of tk (masked columns, zero K/V); sliced off below.
    if lq_pad != Lq:
        dq = lq_pad - Lq
        Q = jnp.pad(Q, ((0, 0), (0, 0), (0, dq), (0, 0)))
        mask = jnp.pad(mask, ((0, 0), (0, 0), (0, dq), (0, 0)))
    lk_eff = Lk
    if flash:
        lk_eff = _round_up(Lk, tk)
        if lk_eff != Lk:
            dkv = lk_eff - Lk
            K = jnp.pad(K, ((0, 0), (0, 0), (0, dkv), (0, 0)))
            V = jnp.pad(V, ((0, 0), (0, 0), (0, dkv), (0, 0)))
            mask = jnp.pad(mask, ((0, 0), (0, 0), (0, 0), (0, dkv)),
                           constant_values=1)

    nh = _pick_heads_per_step(H, tq, tk if flash else lk_eff, Dk, Dv, elem,
                              return_attn and not flash, gen["work_budget"])
    nhm = 1 if Hm == 1 else nh
    HG = H // nh

    qi_sem = "parallel" if gen["qi_parallel"] else "arbitrary"
    # Lane-folded context: [B, H/nh, Lq_pad, nh*Dv]; unfolded to [B,H,Lq,Dv]
    # in the wrapper (layout plumbing, not compute).
    ctx_fold_shape = jax.ShapeDtypeStruct((B, HG, lq_pad, nh * Dv), Q.dtype)

    if not flash:
        grid = (B, HG, lq_pad // tq)

        def q_map(b, hg, qi):
            return (b, hg, qi, 0)

        def kv_map(b, hg, qi):
            return (b, hg, 0, 0)

        mask_map = (lambda b, hg, qi: (b, 0, qi, 0)) if Hm == 1 else q_map
        in_specs = [
            pl.BlockSpec((1, nh, tq, Dk), q_map),
            pl.BlockSpec((1, nh, lk_eff, Dk), kv_map),
            pl.BlockSpec((1, nh, lk_eff, Dv), kv_map),
            pl.BlockSpec((1, nhm, tq, lk_eff), mask_map),
        ]
        ctx_spec = pl.BlockSpec((1, 1, tq, nh * Dv),
                                lambda b, hg, qi: (b, hg, qi, 0))
        if return_attn:
            # attn is emitted in Q.dtype and is already lane-dense (Lk last).
            # TODO(synk): on v5e, pipeline_mode=pl.Buffered(3) on this spec
            # hides the Lq*Lk writeback behind the next tile's compute.
            out_shape = (ctx_fold_shape,
                         jax.ShapeDtypeStruct((B, H, lq_pad, lk_eff), Q.dtype))
            out_specs = (ctx_spec, pl.BlockSpec((1, nh, tq, lk_eff), q_map))
        else:
            out_shape = ctx_fold_shape
            out_specs = ctx_spec
        scratch_shapes = ()
        dims = ("parallel", "parallel", qi_sem)

        def make_kernel(use_concat):
            return _make_dense_kernel(nh, Dv, return_attn, use_concat)
    else:
        grid = (B, HG, lq_pad // tq, lk_eff // tk)

        def q_map(b, hg, qi, ki):
            return (b, hg, qi, 0)

        def kv_map(b, hg, qi, ki):
            return (b, hg, ki, 0)

        mask_map = ((lambda b, hg, qi, ki: (b, 0, qi, ki)) if Hm == 1
                    else (lambda b, hg, qi, ki: (b, hg, qi, ki)))
        in_specs = [
            pl.BlockSpec((1, nh, tq, Dk), q_map),
            pl.BlockSpec((1, nh, tk, Dk), kv_map),
            pl.BlockSpec((1, nh, tk, Dv), kv_map),
            pl.BlockSpec((1, nhm, tq, tk), mask_map),
        ]
        out_shape = ctx_fold_shape
        out_specs = pl.BlockSpec((1, 1, tq, nh * Dv),
                                 lambda b, hg, qi, ki: (b, hg, qi, 0))
        scratch_shapes = (
            pltpu.VMEM((nh, tq, 1), jnp.float32),    # running max
            pltpu.VMEM((nh, tq, 1), jnp.float32),    # running sum
            pltpu.VMEM((nh, tq, Dv), jnp.float32),   # context accumulator
        )
        dims = ("parallel", "parallel", qi_sem, "arbitrary")

        def make_kernel(use_concat):
            return _make_flash_kernel(nh, Dv, use_concat)

    compiler_params = pltpu.CompilerParams(dimension_semantics=dims,
                                           vmem_limit_bytes=gen["vmem_limit"])

    def run(use_concat):
        return pl.pallas_call(
            make_kernel(use_concat),
            out_shape=out_shape,
            grid_spec=pltpu.PrefetchScalarGridSpec(
                num_scalar_prefetch=0,
                grid=grid,
                in_specs=in_specs,
                out_specs=out_specs,
                scratch_shapes=scratch_shapes,
            ),
            compiler_params=compiler_params,
        )(Q, K, V, mask)

    try:
        out = run(use_concat=True)     # single lane-dense store of the fold
    except Exception:
        out = run(use_concat=False)    # per-head slice stores, same HBM layout

    if return_attn and not flash:
        ctx_fold, attn = out
    else:
        ctx_fold, attn = out, None

    ctx = (ctx_fold.reshape(B, HG, lq_pad, nh, Dv)
                   .transpose(0, 1, 3, 2, 4)
                   .reshape(B, H, lq_pad, Dv))[:, :, :Lq, :]
    if attn is not None:
        attn = attn[:, :, :Lq, :]
    return ctx, attn


# ---------------------------------------------------------------------------
# Reference + self-test
# ---------------------------------------------------------------------------
def _reference(Q, K, V, attn_mask):
    d_k = Q.shape[-1]
    scores = jnp.matmul(Q, jnp.swapaxes(K, -1, -2)) / math.sqrt(d_k)
    scores = jnp.where(attn_mask, -1e9, scores)
    attn = jax.nn.softmax(scores, axis=-1)
    context = jnp.matmul(attn, V)
    return context, attn


if __name__ == "__main__":
    tol = dict(atol=1e-2, rtol=1e-2)   # pl.reciprocal(approx=True) in softmax

    key = jax.random.PRNGKey(0)
    k1, k2, k3, k4, k5, k6, k7 = jax.random.split(key, 7)

    # Module-sized shapes: batch=2, heads=2, seq=8, d_k=d_v=16.
    B, H, Lq, Lk, Dk, Dv = 2, 2, 8, 8, 16, 16
    Q = jax.random.normal(k1, (B, H, Lq, Dk), dtype=jnp.float32)
    K = jax.random.normal(k2, (B, H, Lk, Dk), dtype=jnp.float32)
    V = jax.random.normal(k3, (B, H, Lk, Dv), dtype=jnp.float32)
    mask_b1 = jnp.zeros((B, 1, Lq, Lk), dtype=bool).at[..., -2:].set(True)
    mask_bh = jnp.broadcast_to(mask_b1, (B, H, Lq, Lk))

    ctx_want, attn_want = _reference(Q, K, V, mask_bh)

    # 1) head-broadcast [B,1,Lq,Lk] padding mask (DMA'd once per batch).
    ctx, attn = scaled_dot_product_attention(Q, K, V, mask_b1)
    jax.block_until_ready((ctx, attn))
    assert ctx.shape == (B, H, Lq, Dv) and attn.shape == (B, H, Lq, Lk)
    assert jnp.allclose(ctx, ctx_want, **tol)
    assert jnp.allclose(attn, attn_want, **tol)

    # 2) full per-head [B,H,Lq,Lk] mask (the module's shape).
    ctx2, attn2 = scaled_dot_product_attention(Q, K, V, mask_bh)
    jax.block_until_ready((ctx2, attn2))
    assert jnp.allclose(ctx2, ctx_want, **tol)
    assert jnp.allclose(attn2, attn_want, **tol)

    # 3) context-only path (skips the Lq*Lk attention writeback).
    ctx3, none_attn = scaled_dot_product_attention(Q, K, V, mask_b1,
                                                   return_attn=False)
    jax.block_until_ready(ctx3)
    assert none_attn is None
    assert jnp.allclose(ctx3, ctx_want, **tol)

    # 4) Lk-tiled online-softmax path with ragged Lq/Lk (exercises padding).
    B2, H2, Lq2, Lk2, D2 = 1, 2, 12, 200, 32
    Q2 = jax.random.normal(k4, (B2, H2, Lq2, D2), dtype=jnp.float32)
    K2 = jax.random.normal(k5, (B2, H2, Lk2, D2), dtype=jnp.float32)
    V2 = jax.random.normal(k6, (B2, H2, Lk2, D2), dtype=jnp.float32)
    mask2 = jax.random.bernoulli(k7, 0.25, (B2, H2, Lq2, Lk2))
    ctx_want2, _ = _reference(Q2, K2, V2, mask2)
    ctx4, _ = scaled_dot_product_attention(Q2, K2, V2, mask2,
                                           return_attn=False, lk_tile=128)
    jax.block_until_ready(ctx4)
    assert ctx4.shape == (B2, H2, Lq2, D2)
    assert jnp.allclose(ctx4, ctx_want2, **tol)

    print("KERNEL_OK")
</pallas_src>

<mosaic_0001>
module attributes {stable_mosaic.version = 11 : i64} {
  func.func @kernel(%arg0: i32, %arg1: i32, %arg2: i32, %arg3: memref<1x2x8x16xf32, #tpu.memory_space<vmem>>, %arg4: memref<1x2x8x16xf32, #tpu.memory_space<vmem>>, %arg5: memref<1x2x8x16xf32, #tpu.memory_space<vmem>>, %arg6: memref<1x1x8x8xi32, #tpu.memory_space<vmem>>, %arg7: memref<1x1x8x32xf32, #tpu.memory_space<vmem>>, %arg8: memref<1x2x8x8xf32, #tpu.memory_space<vmem>>) attributes {dimension_semantics = [#tpu.dimension_semantics<parallel>, #tpu.dimension_semantics<parallel>, #tpu.dimension_semantics<parallel>], iteration_bounds = array<i64: 2, 1, 1>, scalar_prefetch = 0 : i64, scratch_operands = 0 : i64, tpu.core_type = #tpu.core_type<tc>, window_params = [{transform_indices = @transform_0, window_bounds = array<i64: 1, 2, 8, 16>}, {transform_indices = @transform_1, window_bounds = array<i64: 1, 2, 8, 16>}, {transform_indices = @transform_2, window_bounds = array<i64: 1, 2, 8, 16>}, {transform_indices = @transform_3, window_bounds = array<i64: 1, 1, 8, 8>}, {transform_indices = @transform_4, window_bounds = array<i64: 1, 1, 8, 32>}, {transform_indices = @transform_5, window_bounds = array<i64: 1, 2, 8, 8>}]} {
    %c0 = arith.constant 0 : index
    %c0_0 = arith.constant 0 : index
    %c0_1 = arith.constant 0 : index
    %c0_2 = arith.constant 0 : index
    %0 = vector.load %arg3[%c0, %c0_0, %c0_1, %c0_2] : memref<1x2x8x16xf32, #tpu.memory_space<vmem>>, vector<1x2x8x16xf32>
    %1 = vector.shape_cast %0 : vector<1x2x8x16xf32> to vector<2x8x16xf32>
    %c0_3 = arith.constant 0 : index
    %c0_4 = arith.constant 0 : index
    %c0_5 = arith.constant 0 : index
    %c0_6 = arith.constant 0 : index
    %2 = vector.load %arg4[%c0_3, %c0_4, %c0_5, %c0_6] : memref<1x2x8x16xf32, #tpu.memory_space<vmem>>, vector<1x2x8x16xf32>
    %3 = vector.shape_cast %2 : vector<1x2x8x16xf32> to vector<2x8x16xf32>
    %c0_7 = arith.constant 0 : index
    %c0_8 = arith.constant 0 : index
    %c0_9 = arith.constant 0 : index
    %c0_10 = arith.constant 0 : index
    %4 = vector.load %arg5[%c0_7, %c0_8, %c0_9, %c0_10] : memref<1x2x8x16xf32, #tpu.memory_space<vmem>>, vector<1x2x8x16xf32>
    %5 = vector.shape_cast %4 : vector<1x2x8x16xf32> to vector<2x8x16xf32>
    %c0_11 = arith.constant 0 : index
    %c0_12 = arith.constant 0 : index
    %c0_13 = arith.constant 0 : index
    %c0_14 = arith.constant 0 : index
    %6 = vector.load %arg6[%c0_11, %c0_12, %c0_13, %c0_14] : memref<1x1x8x8xi32, #tpu.memory_space<vmem>>, vector<1x1x8x8xi32>
    %7 = vector.shape_cast %6 : vector<1x1x8x8xi32> to vector<1x8x8xi32>
    %cst = arith.constant 2.500000e-01 : f32
    %8 = vector.broadcast %cst : f32 to vector<2x8x16xf32>
    %9 = arith.mulf %1, %8 : vector<2x8x16xf32>
    "tpu.trace_start"() <{level = 10 : i32, message = "hqd,hkd->hqk"}> : () -> ()
    %cst_15 = arith.constant dense<0.000000e+00> : vector<2x8x8xf32>
    %10 = tpu.matmul %9, %3, %cst_15 {dimension_numbers = #tpu.dot_dimension_numbers<[2], [2], [1], [1], [0, 0, 0, 1, 1, 1], [0], [0]>} : vector<2x8x16xf32>, vector<2x8x16xf32>, vector<2x8x8xf32> -> vector<2x8x8xf32>
    %c0_i32 = arith.constant 0 : i32
    "tpu.trace_stop"() : () -> ()
    %11 = vector.broadcast %c0_i32 : i32 to vector<1x8x8xi32>
    %12 = arith.cmpi ne, %7, %11 : vector<1x8x8xi32>
    %cst_16 = arith.constant -1.000000e+09 : f32
    %13 = vector.shape_cast %12 : vector<1x8x8xi1> to vector<1x8x8xi1>
    %14 = vector.broadcast %13 : vector<1x8x8xi1> to vector<2x8x8xi1>
    %15 = vector.broadcast %cst_16 : f32 to vector<2x8x8xf32>
    %16 = arith.select %14, %15, %10 : vector<2x8x8xi1>, vector<2x8x8xf32>
    %cst_17 = arith.constant dense<0xFF800000> : vector<2x8xf32>
    %17 = vector.multi_reduction <maximumf>, %16, %cst_17 [2] : vector<2x8x8xf32> to vector<2x8xf32>
    %18 = vector.shape_cast %17 : vector<2x8xf32> to vector<2x8x1xf32>
    %19 = vector.broadcast %18 : vector<2x8x1xf32> to vector<2x8x8xf32>
    %20 = arith.subf %16, %19 : vector<2x8x8xf32>
    %21 = math.exp %20 : vector<2x8x8xf32>
    %cst_18 = arith.constant dense<0.000000e+00> : vector<2x8xf32>
    %22 = vector.multi_reduction <add>, %21, %cst_18 [2] : vector<2x8x8xf32> to vector<2x8xf32>
    %23 = vector.shape_cast %22 : vector<2x8xf32> to vector<2x8x1xf32>
    %24 = tpu.reciprocal %23 {approx = true} : vector<2x8x1xf32> -> vector<2x8x1xf32>
    %25 = vector.broadcast %24 : vector<2x8x1xf32> to vector<2x8x8xf32>
    %26 = arith.mulf %21, %25 : vector<2x8x8xf32>
    %27 = vector.extract_strided_slice %26 {offsets = [0, 0, 0], sizes = [1, 8, 8], strides = [1, 1, 1]} : vector<2x8x8xf32> to vector<1x8x8xf32>
    %28 = vector.shape_cast %27 : vector<1x8x8xf32> to vector<8x8xf32>
    %29 = vector.extract_strided_slice %5 {offsets = [0, 0, 0], sizes = [1, 8, 16], strides = [1, 1, 1]} : vector<2x8x16xf32> to vector<1x8x16xf32>
    %30 = vector.shape_cast %29 : vector<1x8x16xf32> to vector<8x16xf32>
    %cst_19 = arith.constant dense<0.000000e+00> : vector<8x16xf32>
    %31 = tpu.matmul %28, %30, %cst_19 {dimension_numbers = #tpu.dot_dimension_numbers<[1], [0], [0], [1], [0, 0, 1, 1], [], []>} : vector<8x8xf32>, vector<8x16xf32>, vector<8x16xf32> -> vector<8x16xf32>
    %32 = vector.extract_strided_slice %26 {offsets = [1, 0, 0], sizes = [1, 8, 8], strides = [1, 1, 1]} : vector<2x8x8xf32> to vector<1x8x8xf32>
    %33 = vector.shape_cast %32 : vector<1x8x8xf32> to vector<8x8xf32>
    %34 = vector.extract_strided_slice %5 {offsets = [1, 0, 0], sizes = [1, 8, 16], strides = [1, 1, 1]} : vector<2x8x16xf32> to vector<1x8x16xf32>
    %35 = vector.shape_cast %34 : vector<1x8x16xf32> to vector<8x16xf32>
    %cst_20 = arith.constant dense<0.000000e+00> : vector<8x16xf32>
    %36 = tpu.matmul %33, %35, %cst_20 {dimension_numbers = #tpu.dot_dimension_numbers<[1], [0], [0], [1], [0, 0, 1, 1], [], []>} : vector<8x8xf32>, vector<8x16xf32>, vector<8x16xf32> -> vector<8x16xf32>
    %37 = tpu.concatenate %31, %36 in 1 : vector<8x16xf32>, vector<8x16xf32> -> vector<8x32xf32>
    %c0_21 = arith.constant 0 : index
    %c0_22 = arith.constant 0 : index
    %c0_23 = arith.constant 0 : index
    %c0_24 = arith.constant 0 : index
    %38 = vector.load %arg7[%c0_21, %c0_22, %c0_23, %c0_24] : memref<1x1x8x32xf32, #tpu.memory_space<vmem>>, vector<1x1x8x32xf32>
    %39 = vector.shape_cast %38 : vector<1x1x8x32xf32> to vector<8x32xf32>
    %40 = vector.shape_cast %37 : vector<8x32xf32> to vector<1x1x8x32xf32>
    tpu.vector_store %arg7[%c0_21, %c0_22, %c0_23, %c0_24], %40 {strides = array<i32>} : memref<1x1x8x32xf32, #tpu.memory_space<vmem>>, vector<1x1x8x32xf32>,
    %c0_25 = arith.constant 0 : index
    %c0_26 = arith.constant 0 : index
    %c0_27 = arith.constant 0 : index
    %c0_28 = arith.constant 0 : index
    %41 = vector.load %arg8[%c0_25, %c0_26, %c0_27, %c0_28] : memref<1x2x8x8xf32, #tpu.memory_space<vmem>>, vector<1x2x8x8xf32>
    %42 = vector.shape_cast %41 : vector<1x2x8x8xf32> to vector<2x8x8xf32>
    %43 = vector.shape_cast %26 : vector<2x8x8xf32> to vector<1x2x8x8xf32>
    tpu.vector_store %arg8[%c0_25, %c0_26, %c0_27, %c0_28], %43 {strides = array<i32>} : memref<1x2x8x8xf32, #tpu.memory_space<vmem>>, vector<1x2x8x8xf32>,
    return
  }
  func.func @transform_0(%arg0: i32, %arg1: i32, %arg2: i32) -> (i32, i32, i32, i32) {
    %c0_i32 = arith.constant 0 : i32
    %c0_i32_0 = arith.constant 0 : i32
    return %arg0, %arg1, %arg2, %c0_i32 : i32, i32, i32, i32
  }
  func.func @transform_1(%arg0: i32, %arg1: i32, %arg2: i32) -> (i32, i32, i32, i32) {
    %c0_i32 = arith.constant 0 : i32
    %c0_i32_0 = arith.constant 0 : i32
    %c0_i32_1 = arith.constant 0 : i32
    return %arg0, %arg1, %c0_i32, %c0_i32_0 : i32, i32, i32, i32
  }
  func.func @transform_2(%arg0: i32, %arg1: i32, %arg2: i32) -> (i32, i32, i32, i32) {
    %c0_i32 = arith.constant 0 : i32
    %c0_i32_0 = arith.constant 0 : i32
    %c0_i32_1 = arith.constant 0 : i32
    return %arg0, %arg1, %c0_i32, %c0_i32_0 : i32, i32, i32, i32
  }
  func.func @transform_3(%arg0: i32, %arg1: i32, %arg2: i32) -> (i32, i32, i32, i32) {
    %c0_i32 = arith.constant 0 : i32
    %c0_i32_0 = arith.constant 0 : i32
    %c0_i32_1 = arith.constant 0 : i32
    return %arg0, %c0_i32, %arg2, %c0_i32_0 : i32, i32, i32, i32
  }
  func.func @transform_4(%arg0: i32, %arg1: i32, %arg2: i32) -> (i32, i32, i32, i32) {
    %c0_i32 = arith.constant 0 : i32
    %c0_i32_0 = arith.constant 0 : i32
    return %arg0, %arg1, %arg2, %c0_i32 : i32, i32, i32, i32
  }
  func.func @transform_5(%arg0: i32, %arg1: i32, %arg2: i32) -> (i32, i32, i32, i32) {
    %c0_i32 = arith.constant 0 : i32
    %c0_i32_0 = arith.constant 0 : i32
    return %arg0, %arg1, %arg2, %c0_i32 : i32, i32, i32, i32
  }
}

module attributes {stable_mosaic.version = 11 : i64} {
  func.func @kernel(%arg0: i32, %arg1: i32, %arg2: i32, %arg3: memref<1x2x8x16xf32, #tpu.memory_space<vmem>>, %arg4: memref<1x2x8x16xf32, #tpu.memory_space<vmem>>, %arg5: memref<1x2x8x16xf32, #tpu.memory_space<vmem>>, %arg6: memref<1x1x8x8xi32, #tpu.memory_space<vmem>>, %arg7: memref<1x1x8x32xf32, #tpu.memory_space<vmem>>, %arg8: memref<1x2x8x8xf32, #tpu.memory_space<vmem>>) attributes {dimension_semantics = [#tpu.dimension_semantics<parallel>, #tpu.dimension_semantics<parallel>, #tpu.dimension_semantics<parallel>], iteration_bounds = array<i64: 2, 1, 1>, scalar_prefetch = 0 : i64, scratch_operands = 0 : i64, tpu.core_type = #tpu.core_type<tc>, window_params = [{transform_indices = @transform_0, window_bounds = array<i64: 1, 2, 8, 16>}, {transform_indices = @transform_1, window_bounds = array<i64: 1, 2, 8, 16>}, {transform_indices = @transform_2, window_bounds = array<i64: 1, 2, 8, 16>}, {transform_indices = @transform_3, window_bounds = array<i64: 1, 1, 8, 8>}, {transform_indices = @transform_4, window_bounds = array<i64: 1, 1, 8, 32>}, {transform_indices = @transform_5, window_bounds = array<i64: 1, 2, 8, 8>}]} {
    %c0 = arith.constant 0 : index
    %c0_0 = arith.constant 0 : index
    %c0_1 = arith.constant 0 : index
    %c0_2 = arith.constant 0 : index
    %0 = vector.load %arg3[%c0, %c0_0, %c0_1, %c0_2] : memref<1x2x8x16xf32, #tpu.memory_space<vmem>>, vector<1x2x8x16xf32>
    %1 = vector.shape_cast %0 : vector<1x2x8x16xf32> to vector<2x8x16xf32>
    %c0_3 = arith.constant 0 : index
    %c0_4 = arith.constant 0 : index
    %c0_5 = arith.constant 0 : index
    %c0_6 = arith.constant 0 : index
    %2 = vector.load %arg4[%c0_3, %c0_4, %c0_5, %c0_6] : memref<1x2x8x16xf32, #tpu.memory_space<vmem>>, vector<1x2x8x16xf32>
    %3 = vector.shape_cast %2 : vector<1x2x8x16xf32> to vector<2x8x16xf32>
    %c0_7 = arith.constant 0 : index
    %c0_8 = arith.constant 0 : index
    %c0_9 = arith.constant 0 : index
    %c0_10 = arith.constant 0 : index
    %4 = vector.load %arg5[%c0_7, %c0_8, %c0_9, %c0_10] : memref<1x2x8x16xf32, #tpu.memory_space<vmem>>, vector<1x2x8x16xf32>
    %5 = vector.shape_cast %4 : vector<1x2x8x16xf32> to vector<2x8x16xf32>
    %c0_11 = arith.constant 0 : index
    %c0_12 = arith.constant 0 : index
    %c0_13 = arith.constant 0 : index
    %c0_14 = arith.constant 0 : index
    %6 = vector.load %arg6[%c0_11, %c0_12, %c0_13, %c0_14] : memref<1x1x8x8xi32, #tpu.memory_space<vmem>>, vector<1x1x8x8xi32>
    %7 = vector.shape_cast %6 : vector<1x1x8x8xi32> to vector<1x8x8xi32>
    %cst = arith.constant 2.500000e-01 : f32
    %8 = vector.broadcast %cst : f32 to vector<2x8x16xf32>
    %9 = arith.mulf %1, %8 : vector<2x8x16xf32>
    "tpu.trace_start"() <{level = 10 : i32, message = "hqd,hkd->hqk"}> : () -> ()
    %cst_15 = arith.constant dense<0.000000e+00> : vector<2x8x8xf32>
    %10 = tpu.matmul %9, %3, %cst_15 {dimension_numbers = #tpu.dot_dimension_numbers<[2], [2], [1], [1], [0, 0, 0, 1, 1, 1], [0], [0]>} : vector<2x8x16xf32>, vector<2x8x16xf32>, vector<2x8x8xf32> -> vector<2x8x8xf32>
    %c0_i32 = arith.constant 0 : i32
    "tpu.trace_stop"() : () -> ()
    %11 = vector.broadcast %c0_i32 : i32 to vector<1x8x8xi32>
    %12 = arith.cmpi ne, %7, %11 : vector<1x8x8xi32>
    %cst_16 = arith.constant -1.000000e+09 : f32
    %13 = vector.shape_cast %12 : vector<1x8x8xi1> to vector<1x8x8xi1>
    %14 = vector.broadcast %13 : vector<1x8x8xi1> to vector<2x8x8xi1>
    %15 = vector.broadcast %cst_16 : f32 to vector<2x8x8xf32>
    %16 = arith.select %14, %15, %10 : vector<2x8x8xi1>, vector<2x8x8xf32>
    %cst_17 = arith.constant dense<0xFF800000> : vector<2x8xf32>
    %17 = vector.multi_reduction <maximumf>, %16, %cst_17 [2] : vector<2x8x8xf32> to vector<2x8xf32>
    %18 = vector.shape_cast %17 : vector<2x8xf32> to vector<2x8x1xf32>
    %19 = vector.broadcast %18 : vector<2x8x1xf32> to vector<2x8x8xf32>
    %20 = arith.subf %16, %19 : vector<2x8x8xf32>
    %21 = math.exp %20 : vector<2x8x8xf32>
    %cst_18 = arith.constant dense<0.000000e+00> : vector<2x8xf32>
    %22 = vector.multi_reduction <add>, %21, %cst_18 [2] : vector<2x8x8xf32> to vector<2x8xf32>
    %23 = vector.shape_cast %22 : vector<2x8xf32> to vector<2x8x1xf32>
    %24 = tpu.reciprocal %23 {approx = true} : vector<2x8x1xf32> -> vector<2x8x1xf32>
    %25 = vector.broadcast %24 : vector<2x8x1xf32> to vector<2x8x8xf32>
    %26 = arith.mulf %21, %25 : vector<2x8x8xf32>
    %27 = vector.extract_strided_slice %26 {offsets = [0, 0, 0], sizes = [1, 8, 8], strides = [1, 1, 1]} : vector<2x8x8xf32> to vector<1x8x8xf32>
    %28 = vector.shape_cast %27 : vector<1x8x8xf32> to vector<8x8xf32>
    %29 = vector.extract_strided_slice %5 {offsets = [0, 0, 0], sizes = [1, 8, 16], strides = [1, 1, 1]} : vector<2x8x16xf32> to vector<1x8x16xf32>
    %30 = vector.shape_cast %29 : vector<1x8x16xf32> to vector<8x16xf32>
    %cst_19 = arith.constant dense<0.000000e+00> : vector<8x16xf32>
    %31 = tpu.matmul %28, %30, %cst_19 {dimension_numbers = #tpu.dot_dimension_numbers<[1], [0], [0], [1], [0, 0, 1, 1], [], []>} : vector<8x8xf32>, vector<8x16xf32>, vector<8x16xf32> -> vector<8x16xf32>
    %32 = vector.extract_strided_slice %26 {offsets = [1, 0, 0], sizes = [1, 8, 8], strides = [1, 1, 1]} : vector<2x8x8xf32> to vector<1x8x8xf32>
    %33 = vector.shape_cast %32 : vector<1x8x8xf32> to vector<8x8xf32>
    %34 = vector.extract_strided_slice %5 {offsets = [1, 0, 0], sizes = [1, 8, 16], strides = [1, 1, 1]} : vector<2x8x16xf32> to vector<1x8x16xf32>
    %35 = vector.shape_cast %34 : vector<1x8x16xf32> to vector<8x16xf32>
    %cst_20 = arith.constant dense<0.000000e+00> : vector<8x16xf32>
    %36 = tpu.matmul %33, %35, %cst_20 {dimension_numbers = #tpu.dot_dimension_numbers<[1], [0], [0], [1], [0, 0, 1, 1], [], []>} : vector<8x8xf32>, vector<8x16xf32>, vector<8x16xf32> -> vector<8x16xf32>
    %c0_21 = arith.constant 0 : index
    %c0_22 = arith.constant 0 : index
    %c0_23 = arith.constant 0 : index
    %c0_24 = arith.constant 0 : index
    %37 = vector.load %arg7[%c0_21, %c0_22, %c0_23, %c0_24] : memref<1x1x8x32xf32, #tpu.memory_space<vmem>>, vector<1x1x8x16xf32>
    %38 = vector.shape_cast %37 : vector<1x1x8x16xf32> to vector<8x16xf32>
    %39 = vector.shape_cast %31 : vector<8x16xf32> to vector<1x1x8x16xf32>
    tpu.vector_store %arg7[%c0_21, %c0_22, %c0_23, %c0_24], %39 {strides = array<i32>} : memref<1x1x8x32xf32, #tpu.memory_space<vmem>>, vector<1x1x8x16xf32>,
    %c0_25 = arith.constant 0 : index
    %c0_26 = arith.constant 0 : index
    %c0_27 = arith.constant 0 : index
    %c16 = arith.constant 16 : index
    %40 = vector.load %arg7[%c0_25, %c0_26, %c0_27, %c16] : memref<1x1x8x32xf32, #tpu.memory_space<vmem>>, vector<1x1x8x16xf32>
    %41 = vector.shape_cast %40 : vector<1x1x8x16xf32> to vector<8x16xf32>
    %42 = vector.shape_cast %36 : vector<8x16xf32> to vector<1x1x8x16xf32>
    tpu.vector_store %arg7[%c0_25, %c0_26, %c0_27, %c16], %42 {strides = array<i32>} : memref<1x1x8x32xf32, #tpu.memory_space<vmem>>, vector<1x1x8x16xf32>,
    %c0_28 = arith.constant 0 : index
    %c0_29 = arith.constant 0 : index
    %c0_30 = arith.constant 0 : index
    %c0_31 = arith.constant 0 : index
    %43 = vector.load %arg8[%c0_28, %c0_29, %c0_30, %c0_31] : memref<1x2x8x8xf32, #tpu.memory_space<vmem>>, vector<1x2x8x8xf32>
    %44 = vector.shape_cast %43 : vector<1x2x8x8xf32> to vector<2x8x8xf32>
    %45 = vector.shape_cast %26 : vector<2x8x8xf32> to vector<1x2x8x8xf32>
    tpu.vector_store %arg8[%c0_28, %c0_29, %c0_30, %c0_31], %45 {strides = array<i32>} : memref<1x2x8x8xf32, #tpu.memory_space<vmem>>, vector<1x2x8x8xf32>,
    return
  }
  func.func @transform_0(%arg0: i32, %arg1: i32, %arg2: i32) -> (i32, i32, i32, i32) {
    %c0_i32 = arith.constant 0 : i32
    %c0_i32_0 = arith.constant 0 : i32
    return %arg0, %arg1, %arg2, %c0_i32 : i32, i32, i32, i32
  }
  func.func @transform_1(%arg0: i32, %arg1: i32, %arg2: i32) -> (i32, i32, i32, i32) {
    %c0_i32 = arith.constant 0 : i32
    %c0_i32_0 = arith.constant 0 : i32
    %c0_i32_1 = arith.constant 0 : i32
    return %arg0, %arg1, %c0_i32, %c0_i32_0 : i32, i32, i32, i32
  }
  func.func @transform_2(%arg0: i32, %arg1: i32, %arg2: i32) -> (i32, i32, i32, i32) {
    %c0_i32 = arith.constant 0 : i32
    %c0_i32_0 = arith.constant 0 : i32
    %c0_i32_1 = arith.constant 0 : i32
    return %arg0, %arg1, %c0_i32, %c0_i32_0 : i32, i32, i32, i32
  }
  func.func @transform_3(%arg0: i32, %arg1: i32, %arg2: i32) -> (i32, i32, i32, i32) {
    %c0_i32 = arith.constant 0 : i32
    %c0_i32_0 = arith.constant 0 : i32
    %c0_i32_1 = arith.constant 0 : i32
    return %arg0, %c0_i32, %arg2, %c0_i32_0 : i32, i32, i32, i32
  }
  func.func @transform_4(%arg0: i32, %arg1: i32, %arg2: i32) -> (i32, i32, i32, i32) {
    %c0_i32 = arith.constant 0 : i32
    %c0_i32_0 = arith.constant 0 : i32
    return %arg0, %arg1, %arg2, %c0_i32 : i32, i32, i32, i32
  }
  func.func @transform_5(%arg0: i32, %arg1: i32, %arg2: i32) -> (i32, i32, i32, i32) {
    %c0_i32 = arith.constant 0 : i32
    %c0_i32_0 = arith.constant 0 : i32
    return %arg0, %arg1, %arg2, %c0_i32 : i32, i32, i32, i32
  }
}

</mosaic_0001>

<bundles_post_ra>
// kernel: tpu_custom_call.1
= control target key start
LH: loop header
LB: loop body
LE: loop exit
PB: predicated region body
PF: predicated region fallthrough
CT: control target
= control target key end

     0   :  { %s1723_s0 = inlined_call_operand.hbm [shape: f32[2,2,8,16], index: 0, kind: input, shape index: {}]   ;;  %s1724_s1 = inlined_call_operand.hbm [shape: f32[2,2,8,16], index: 1, kind: input, shape index: {}]   ;;  %s1725_s2 = inlined_call_operand.hbm [shape: f32[2,2,8,16], index: 2, kind: input, shape index: {}]   ;;  %s1726_s3 = inlined_call_operand.hbm [shape: s32[2,1,8,8], index: 3, kind: input, shape index: {}]   ;;  %s1727_s4 = inlined_call_operand.hbm [shape: f32[2,1,8,32], index: 4, kind: output, shape index: {0}]   ;;  %s1728_s5 = inlined_call_operand.hbm [shape: f32[2,2,8,8], index: 5, kind: output, shape index: {1}]  }
   0x1   :  { %1736 = sst [smem:[#allocation23_spill]] %s1724_s1 }
   0x2   :  { %1737 = sst [smem:[#allocation24_spill]] %s1727_s4 }
   0x3   :  { %11 = vsyncpa [#allocation3], 0 }
   0x4   :  { %13 = vsyncpa [#allocation3 + $0x1], 0 }
   0x5   :  { %14 = vsyncpa [#allocation6], 0 }
   0x6   :  { %16 = vsyncpa [#allocation6 + $0x1], 0 }
   0x7   :  { %17 = vsyncpa [#allocation9], 0 }
   0x8   :  { %19 = vsyncpa [#allocation9 + $0x1], 0 }
   0x9   :  { %20 = vsyncpa [#allocation4], 0 }
   0xa   :  { %22 = vsyncpa [#allocation4 + $0x1], 0 }
   0xb   :  { %23 = vsyncpa [#allocation12], 0 }
   0xc   :  { %25 = vsyncpa [#allocation12 + $0x1], 0  ;;  %s1437_s18 = smov 0   ;;  %s1439_s19 = smov 0  }
   0xd   :  { %s1441_s20 = smov 0   ;;  %s1443_s21 = smov 0  }
   0xe   :  { %s1445_s22 = smov 0   ;;  %s1447_s23 = smov 0  }
   0xf LB: > { %1738 = sst [smem:[#allocation18_spill]] %s1372_s18  ;;  %s1468_s24 = sadd.s32 4294967295, %s1392_s23   ;;  %s1392_s23 = sphi %s1447_s23, %s31_s23   ;;  %s1388_s22 = sphi %s1445_s22, %s1761_s22   ;;  %s1384_s21 = sphi %s1443_s21, %s1760_s21   ;;  %s1380_s20 = sphi %s1441_s20, %s1756_s20   ;;  %s1376_s19 = sphi %s1439_s19, %s1759_s19   ;;  %s1372_s18 = sphi %s1437_s18, %s1758_s18  }
  0x10   : > { %1739 = sst [smem:[#allocation19_spill]] %s1380_s20  ;;  %s999_s25 = sadd.s32 4294967294, %s1392_s23  }
  0x11   : > { %s50_s26 = sadd.s32 1, %s1388_s22  ;;  %s61_s27 = sadd.s32 1, %s1380_s20 }
  0x12   : > { %p52_p0 = scmp.ge.s32.totalorder %s50_s26, 2  ;;  %p68_p1 = scmp.ne.s32.totalorder %s1380_s20, %s1376_s19 }
  0x13   : > { %p69_p2 = scmp.eq.s32.totalorder %s1392_s23, 0  ;;  %p74_p3 = scmp.ne.s32.totalorder %s1376_s19, %s1372_s18 }
  0x14   : > { %s1763_s26 = smov (%p52_p0, %s50_s26), 0  ;;  %p75_p5 = scmp.eq.s32.totalorder %s1468_s24, 0 }
  0x15   : > { %1740 = sst [smem:[#allocation20_spill]] %s1763_s26  ;;  %p1480_p4 = por %p69_p2, %p68_p1 }
  0x16   : > { %s54_s29 = ssub.s32 %s1388_s22, %s1763_s26  ;;  %p186_p6 = scmp.eq.s32.totalorder %s1468_s24, 1 }
  0x17   : > { %p59_p7 = scmp.eq.s32.totalorder %s54_s29, 0  ;;  %p1488_p8 = por %p75_p5, %p74_p3 }
  0x18   : > { %p1492_p9 = por %p186_p6, %p68_p1  ;;  %p192_p10 = scmp.eq.s32.totalorder %s999_s25, 1 }
  0x19   : > { %s1497_s7 = scalar_select %p59_p7, %s1380_s20, %s61_s27  }
  0x1a   : > { %p1499_p11 = por %p192_p10, %p74_p3  ;;  %p1097_p13 = scmp.lt.s32.totalorder %s1392_s23, 2 }
  0x1b   : > { %1744 = sst [smem:[#allocation21_spill]] %s1497_s7  ;;  %s1506_s9 = sand.u32 1, %s1380_s20  }
  0x1c   : > { %s1745_s8 = scalar_select %p1499_p11, 1, 0 }
  0x1d   : > { %s1509_s10 = sshll.u32 %s1506_s9, 4  ;;  %s1512_s11 = sshll.u32 %s1388_s22, 8 }
  0x1e   : > { %1746 = sst [smem:[#allocation22_spill]] %s1745_s8  ;;  %p1516_p0 = pnand %p1097_p13, %p1480_p4 }
  0x1f   : > { %s266_s13 = sand.u32 1, %s1392_s23   ;;  %s1748_s1 = sld [smem:[#allocation23_spill]] }
  0x20   : > { %s270_s17 = scalar_lea.vmem [#allocation5], %s1509_s10  ;;  %p1013_p1 = scmp.ge.s32.totalorder %s1392_s23, 1 }
  0x21   : > { %s279_s25 = sshll.u32 %s270_s17, 4  ;;  %p329_p2 = scmp.lt.s32.totalorder %s1392_s23, 3  ;;  %s280_s25 = int_to_ptr.vmem [resolvable:$true] %s279_s25 }
  0x22   : > { %s1528_s27 = scalar_lea.sflag [#allocation6], %s266_s13  ;;  %p1164_p3 = pneg %p1516_p0 }
  0x23   : > { %s1175_s28 = scalar_lea.vmem %s280_s25, 256  ;;  %s1394_s29 = smov [#allocation5]  }
  0x24   : > { %p1176_p4 = scmp.ne.s32.totalorder %s280_s25, %s1175_s28  ;;  %s1180_s26 = sshll.u32 %s1394_s29, 4  ;;  %s1181_s26 = int_to_ptr.vmem [resolvable:$false] %s1180_s26 }
  0x25   : > { %s278_s16 = scalar_lea.hbm %s1748_s1, %s1512_s11  ;;  %s1182_s14 = scalar_lea.vmem %s1181_s26, 512 }
  0x26   : > { %p1178_p5 = pnand %p1176_p4, %p1164_p3  ;;  %p1183_p7 = scmp.lt.s32.totalorder %s280_s25, %s1181_s26 }
  0x27   : > { %p1184_p10 = scmp.lt.s32.totalorder %s1182_s14, %s1175_s28 }
  0x28   : > { %p1179_p6 = pneg %p1178_p5 }
  0x29   : > { %p1185_p13 = por %p1184_p10, %p1183_p7 }
  0x2b   : > { %p1186_p12 = pnand %p1185_p13, %p1179_p6 }
  0x2d   : > { %1189 = shalt.err (!%p1186_p12)
}
  0x2e   : > { %s1734_s15 = smov 128   ;;  %s1396_s13 = smov 8  }
  0x2f   : > { %1083 = dma.hbm_to_vmem [thread:$0]  (!%p1516_p0), %s278_s16, 256, %s280_s25, %s1528_s27, %s1734_s15, %s1734_s15, %s1396_s13  }
  0x30   : > { %p1545_p4 = pnand %p1013_p1, %p329_p2  ;;  %s255_s29 = scalar_lea.hbm %s1723_s0, %s1512_s11 }
  0x31   : > { %s246_s14 = scalar_lea.vmem [#allocation2], %s1509_s10  ;;  %s301_s8 = scalar_lea.hbm %s1725_s2, %s1512_s11 }
  0x32   : > { %s256_s1 = sshll.u32 %s246_s14, 4  ;;  %s243_s18 = scalar_lea.sflag [#allocation3], %s1506_s9  ;;  %s257_s1 = int_to_ptr.vmem [resolvable:$true] %s256_s1 }
  0x33   : > { %s1203_s4 = scalar_lea.vmem %s257_s1, 256  ;;  %s1397_s16 = smov [#allocation2]  }
  0x34   : > { %p1204_p12 = scmp.ne.s32.totalorder %s257_s1, %s1203_s4  ;;  %s1208_s25 = sshll.u32 %s1397_s16, 4  ;;  %s1209_s25 = int_to_ptr.vmem [resolvable:$false] %s1208_s25 }
  0x35   : > { %s1210_s15 = scalar_lea.vmem %s1209_s25, 512  ;;  %p1211_p5 = scmp.lt.s32.totalorder %s257_s1, %s1209_s25 }
  0x36   : > { %p1206_p1 = pnand %p1204_p12, %p1164_p3  ;;  %p1212_p6 = scmp.lt.s32.totalorder %s1210_s15, %s1203_s4 }
  0x38   : > { %p1207_p2 = pneg %p1206_p1  ;;  %p1213_p7 = por %p1212_p6, %p1211_p5 }
  0x3a   : > { %p1214_p10 = pnand %p1213_p7, %p1207_p2 }
  0x3c   : > { %1217 = shalt.err (!%p1214_p10)
}
  0x3d   : > { %s1750_s20 = smov 128   ;;  %s293_s7 = scalar_lea.vmem [#allocation7], %s1509_s10 }
  0x3e   : > { %1080 = dma.hbm_to_vmem [thread:$0]  (!%p1516_p0), %s255_s29, 256, %s257_s1, %s243_s18, %s1750_s20, %s1750_s20, %s1396_s13  }
  0x3f   : > { %s302_s17 = sshll.u32 %s293_s7, 4  ;;  %s1011_s28 = sshll.u32 %s1506_s9, 3  ;;  %s303_s17 = int_to_ptr.vmem [resolvable:$true] %s302_s17 }
  0x40   : > { %s1231_s14 = scalar_lea.vmem %s303_s17, 256  ;;  %s1398_s4 = smov [#allocation7]  }
  0x41   : > { %p1232_p13 = scmp.ne.s32.totalorder %s303_s17, %s1231_s14  ;;  %s1236_s15 = sshll.u32 %s1398_s4, 4  ;;  %s1237_s15 = int_to_ptr.vmem [resolvable:$false] %s1236_s15 }
  0x42   : > { %s1238_s16 = scalar_lea.vmem %s1237_s15, 512  ;;  %p1239_p2 = scmp.lt.s32.totalorder %s303_s17, %s1237_s15 }
  0x43   : > { %p1234_p12 = pnand %p1232_p13, %p1164_p3  ;;  %p1240_p5 = scmp.lt.s32.totalorder %s1238_s16, %s1231_s14 }
  0x45   : > { %p1235_p1 = pneg %p1234_p12  ;;  %p1241_p6 = por %p1240_p5, %p1239_p2 }
  0x47   : > { %p1242_p7 = pnand %p1241_p6, %p1235_p1 }
  0x49   : > { %1245 = shalt.err (!%p1242_p7)
}
  0x4a   : > { %1086 = dma.hbm_to_vmem [thread:$0]  (!%p1516_p0), %s301_s8, 256, %s303_s17, %s1528_s27, %s1750_s20, %s1750_s20, %s1396_s13  }
  0x4b   : > { %s1012_s10 = sshll.u32 %s1388_s22, 7  ;;  %s316_s14 = scalar_lea.vmem [#allocation8], %s1011_s28 }
  0x4c   : > { %s322_s7 = scalar_lea.hbm %s1726_s3, %s1012_s10  ;;  %s324_s4 = sshll.u32 %s316_s14, 4  ;;  %s325_s4 = int_to_ptr.vmem [resolvable:$true] %s324_s4 }
  0x4d   : > { %s313_s15 = scalar_lea.sflag [#allocation9], %s1506_s9  ;;  %s1259_s16 = scalar_lea.vmem %s325_s4, 128 }
  0x4e   : > { %p1260_p10 = scmp.ne.s32.totalorder %s325_s4, %s1259_s16  ;;  %s1399_s11 = smov [#allocation8]  }
  0x4f   : > { %s1264_s1 = sshll.u32 %s1399_s11, 4  ;;  %s1265_s1 = int_to_ptr.vmem [resolvable:$false] %s1264_s1 }
  0x50   : > { %p1262_p13 = pnand %p1260_p10, %p1164_p3  ;;  %s1266_s18 = scalar_lea.vmem %s1265_s1, 256 }
  0x51   : > { %p1267_p1 = scmp.lt.s32.totalorder %s325_s4, %s1265_s1  ;;  %p1268_p2 = scmp.lt.s32.totalorder %s1266_s18, %s1259_s16 }
  0x52   : > { %p1263_p12 = pneg %p1262_p13 }
  0x53   : > { %p1269_p5 = por %p1268_p2, %p1267_p1 }
  0x55   : > { %p1270_p6 = pnand %p1269_p5, %p1263_p12 }
  0x57   : > { %1273 = shalt.err (!%p1270_p6)
}
  0x58   : > { %1089 = dma.hbm_to_vmem [thread:$0]  (!%p1516_p0), %s322_s7, 128, %s325_s4, %s313_s15  }
  0x59   : > { %333 = sbr.rel (%p1545_p4) target bundleno = 935 (0x3a7), region = 36  ;;  %s1596_s8 = sand.u32 (!%p1545_p4), 1, %s1376_s19  }
  0x5a   : > { %s1599_s9 = sshll.u32 (!%p1545_p4), %s1596_s8, 4  ;;  %s336_s27 = scalar_lea.sflag (!%p1545_p4), [#allocation3], %s1596_s8 }
  0x5b   : > { %s339_s13 = scalar_lea.vmem (!%p1545_p4), [#allocation2], %s1599_s9 }
  0x5e   : > { %1351 = dma.done.wait (%p1488_p8), %s336_s27, 256  }
  0x5f   : > { %1353 = vsyncadd (%p1488_p8), %s336_s27, 4294967040  ;;  %s344_s12 = sand.u32 1, %s1468_s24   ;;  %s348_s20 = scalar_lea.vmem [#allocation5], %s1599_s9 }
  0x60   : > { %s345_s26 = scalar_lea.sflag [#allocation6], %s344_s12 }
  0x61   : > { %1355 = dma.done.wait (%p1488_p8), %s345_s26, 512  }
  0x62   : > { %1357 = vsyncadd (%p1488_p8), %s345_s26, 4294966784  ;;  %s1017_s17 = sshll.u32 %s1596_s8, 3  ;;  %s357_s28 = scalar_lea.vmem [#allocation7], %s1599_s9 }
  0x63   : > { %s363_s10 = scalar_lea.sflag [#allocation9], %s1596_s8  ;;  %s366_s29 = scalar_lea.vmem [#allocation8], %s1017_s17 }
  0x64   : > { %1359 = dma.done.wait (%p1488_p8), %s363_s10, 128  }
  0x65   : > { %1361 = vsyncadd (%p1488_p8), %s363_s10, 4294967168  ;;  %v1400_v0 = vmov 0.0   ;;  %vm1401_vm0 = vmmov 0   ;;  %vm426_vm1 = vcmask 130048   ;;  %v420_v1 = vld [vmem:[%s348_s20 + $0x8] sm:$0xff]  ;;  %v419_v3 = vld [vmem:[%s348_s20] sm:$0xff] }
  0x66   : > { %1050 = vmatprep.subr.mxu1 %v1400_v0  ;;  %1052 = vmatprep.mubr.msk.f32.mxu1 %vm1401_vm0, %v1400_v0  ;;  %v418_v2 = vld [vmem:[%s339_s13 + $0x8] sm:$0xff]  ;;  %v417_v5 = vld [vmem:[%s339_s13] sm:$0xff]  ;;  %vm584_vm3 = vcmask 64512   ;;  %s412_s24 = scalar_lea.vmem [#allocation11], %s1599_s9  ;;  %s1036_s30 = sshll.u32 %s1384_s21, 8 }
  0x67   : > { %1045 = vmatprep.subr.mxu0 %v1400_v0  ;;  %1047 = vmatprep.mubr.msk.f32.mxu0 %vm1401_vm0, %v1400_v0  ;;  %v425_v4 = vmul.f32 0.25, %v418_v2  ;;  %v424_v6 = vmul.f32 0.25, %v417_v5  ;;  %v423_v7 = vld [vmem:[%s366_s29] sm:$0xff]  ;;  %v422_v26 = vld [vmem:[%s357_s28 + $0x8] sm:$0xff]  ;;  %s799_s25 = sshll.u32 %s412_s24, 4  ;;  %s1647_s4 = scalar_lea.hbm %s1728_s5, %s1036_s30  ;;  %s1649_s25 = int_to_ptr.vmem [resolvable:$true] %s799_s25 }
  0x68   : > { %1051 = vmatpush3.xpose.msk.msra.mxu1 %vm426_vm1, %v420_v1  ;;  %1046 = vmatpush3.xpose.msk.msra.mxu0 %vm426_vm1, %v419_v3  ;;  %vm579_vm2 = vcmp.ne.s32.totalorder %v423_v7, 0  ;;  %v421_v27 = vld [vmem:[%s357_s28] sm:$0xff]  ;;  %s768_s15 = scalar_lea.sflag [#allocation12], %s1596_s8  ;;  %s1274_s16 = scalar_lea.vmem %s1649_s25, 256 }
  0x69   : > { %1060 = vmatprep.subr.mxu1 %v1400_v0  ;;  %1055 = vmatprep.subr.mxu0 %v1400_v0  ;;  %p1275_p8 = scmp.ne.s32.totalorder %s1649_s25, %s1274_s16  ;;  %s1402_s11 = smov [#allocation11]  }
  0x6a   : > { %s1278_s1 = sshll.u32 %s1402_s11, 4  ;;  %s1279_s1 = int_to_ptr.vmem [resolvable:$false] %s1278_s1 }
  0x6b   : > { %1053 = vmatmul.mubr.msk.f32.vlgmr.msra.gmra.mxu1 %vm426_vm1, %v425_v4  ;;  %1048 = vmatmul.mubr.msk.f32.vlgmr.msra.gmra.mxu0 %vm426_vm1, %v424_v6  ;;  %p1276_p0 = pnand %p1275_p8, %p1492_p9  ;;  %s1280_s18 = scalar_lea.vmem %s1279_s1, 512 }
  0x6c   : > { %1062 = vmatprep.mubr.msk.f32.mxu1 %vm1401_vm0, %v1400_v0  ;;  %1057 = vmatprep.mubr.msk.f32.mxu0 %vm1401_vm0, %v1400_v0  ;;  %p1281_p4 = scmp.lt.s32.totalorder %s1649_s25, %s1279_s1  ;;  %p1282_p7 = scmp.lt.s32.totalorder %s1280_s18, %s1274_s16 }
  0x6d   : > { %1061 = vmatpush3.msra.mxu1 %v422_v26  ;;  %1056 = vmatpush3.msra.mxu0 %v421_v27  ;;  %p1277_p3 = pneg %p1276_p0 }
  0x6e   : > { %p1283_p10 = por %p1282_p7, %p1281_p4 }
  0x70   : > { %p1284_p13 = pnand %p1283_p10, %p1277_p3 }
 0x12b   : > { %v575_v8 = vpop.f32.mrf.mxu1  ;;  %v499_v9 = vpop.f32.mrf.mxu0 }
 0x12c   : > { %v583_v10 = vsel %vm579_vm2, -1e+09, %v575_v8  ;;  %v582_v11 = vsel %vm579_vm2, -1e+09, %v499_v9 }
 0x12d   : > { %v1054_v12 = vpop.f32.mrf.mxu1  ;;  %v588_v13 = vsel %vm584_vm3, %v583_v10, -inf  ;;  %v1049_v14 = vpop.f32.mrf.mxu0  ;;  %v585_v15 = vsel %vm584_vm3, %v582_v11, -inf }
 0x12e   : > { %589 = vmax.xlane.f32.xlu0 %v588_v13 }
 0x132   : > { %586 = vmax.xlane.f32.xlu0 %v585_v15 }
 0x1b7   : > { %v590_v16 = vpop.xlane.xlu0 %589 }
 0x1b8   : > { %v592_v17 = vsub.f32 %v583_v10, %v590_v16 }
 0x1ba   : > { %v595_v18 = vmul.f32 1.442695, %v592_v17 }
 0x1bb   : > { %v587_v19 = vpop.xlane.xlu0 %586 }
 0x1bc   : > { %1154 = vpow2.f32 %v595_v18  ;;  %v591_v20 = vsub.f32 %v582_v11, %v587_v19 }
 0x1be   : > { %v593_v21 = vmul.f32 1.442695, %v591_v20 }
 0x1c0   : > { %1156 = vpow2.f32 %v593_v21 }
 0x1c9   : > { %v1155_v22 = vpop.eup %1154 }
 0x1ca   : > { %v600_v23 = vsel %vm584_vm3, %v1155_v22, 0.0 }
 0x1cb   : > { %601 = vadd.xlane.f32.xlu1 %v600_v23 }
 0x1cd   : > { %v1157_v24 = vpop.eup %1156 }
 0x1ce   : > { %v597_v25 = vsel %vm584_vm3, %v1157_v24, 0.0 }
 0x1cf   : > { %598 = vadd.xlane.f32.xlu1 %v597_v25 }
 0x254   : > { %v602_v28 = vpop.xlane.xlu1 %601 }
 0x255   : > { %1158 = vrcp.f32 %v602_v28 }
 0x258   : > { %v599_v29 = vpop.xlane.xlu1 %598 }
 0x259   : > { %1160 = vrcp.f32 %v599_v29 }
 0x262   : > { %v1159_v30 = vpop.eup %1158 }
 0x263   : > { %v606_v31 = vmul.f32 %v1159_v30, %v1155_v22 }
 0x265   : > { %1063 = vmatmul.mubr.msk.f32.vlgmr.msra.gmra.mxu1 %vm584_vm3, %v606_v31  ;;  %761 = vst.msk [vmem:[%s412_s24 + $0x8] sm:$0xff] %vm584_vm3, %v606_v31 }
 0x266   : > { %v1161_v32 = vpop.eup %1160 }
 0x267   : > { %v605_v33 = vmul.f32 %v1161_v32, %v1157_v24 }
 0x269   : > { %1058 = vmatmul.mubr.msk.f32.vlgmr.msra.gmra.mxu0 %vm584_vm3, %v605_v33  ;;  %760 = vst.msk [vmem:[%s412_s24] sm:$0xff] %vm584_vm3, %v605_v33 }
 0x26a   : > { %1287 = shalt.err (!%p1284_p13)
}
 0x26b   : > { %s1288_s9 = scalar_lea.hbm %s1647_s4, 256  ;;  %s1292_s12 = scalar_lea.hbm %s1728_s5, 512 }
 0x26c   : > { %p1289_p12 = scmp.ne.s32.totalorder %s1647_s4, %s1288_s9  ;;  %p1293_p5 = scmp.lt.s32.totalorder %s1647_s4, %s1728_s5 }
 0x26d   : > { %p1294_p6 = scmp.lt.s32.totalorder %s1292_s12, %s1288_s9 }
 0x26e   : > { %p1290_p1 = pnand %p1289_p12, %p1492_p9 }
 0x26f   : > { %p1295_p8 = por %p1294_p6, %p1293_p5 }
 0x270   : > { %p1291_p2 = pneg %p1290_p1 }
 0x272   : > { %p1296_p0 = pnand %p1295_p8, %p1291_p2 }
 0x274   : > { %1299 = shalt.err (!%p1296_p0)
}
 0x275   : > { %s1403_s28 = smov 128   ;;  %s1404_s10 = smov 8   ;;  %vm758_vm4 = vcmask 261120  }
 0x276   : > { %1074 = dma.vmem_to_hbm [thread:$0]  (%p1492_p9), %s1649_s25, 256, %s1647_s4, %s768_s15, %s1403_s28, %s1403_s28, %s1404_s10  }
 0x277   : > { %s1405_s29 = smov 16   ;;  %s1028_s24 = sshll.u32 %s1384_s21, 7 }
 0x278   : > { %s405_s30 = scalar_lea.vmem [#allocation10], %s1017_s17  ;;  %s1751_s11 = sld [smem:[#allocation24_spill]] }
 0x279   : > { %s783_s7 = sshll.u32 %s405_s30, 4  ;;  %s763_s25 = scalar_lea.sflag [#allocation4], %s1596_s8  ;;  %s784_s7 = int_to_ptr.vmem [resolvable:$true] %s783_s7 }
 0x27a   : > { %s1300_s4 = scalar_lea.vmem %s784_s7, 128  ;;  %s1406_s21 = smov [#allocation10]  }
 0x27b   : > { %p1301_p3 = scmp.ne.s32.totalorder %s784_s7, %s1300_s4  ;;  %s1304_s17 = sshll.u32 %s1406_s21, 4  ;;  %s1305_s17 = int_to_ptr.vmem [resolvable:$false] %s1304_s17 }
 0x27c   : > { %s1306_s15 = scalar_lea.vmem %s1305_s17, 256  ;;  %p1307_p10 = scmp.lt.s32.totalorder %s784_s7, %s1305_s17 }
 0x27d   : > { %p1302_p4 = pnand %p1301_p3, %p1492_p9  ;;  %p1308_p13 = scmp.lt.s32.totalorder %s1306_s15, %s1300_s4 }
 0x27e   : > { %s1680_s1 = scalar_lea.hbm %s1751_s11, %s1028_s24 }
 0x27f   : > { %p1303_p7 = pneg %p1302_p4  ;;  %p1309_p12 = por %p1308_p13, %p1307_p10 }
 0x281   : > { %p1310_p1 = pnand %p1309_p12, %p1303_p7 }
 0x325   : > { %v749_v34 = vpop.f32.mrf.mxu1 }
 0x326   : > { %754 = vrot.lane.b32.xlu0 %v749_v34, %s1405_s29 }
 0x327   : > { %v1064_v35 = vpop.f32.mrf.mxu1 }
 0x329   : > { %v676_v36 = vpop.f32.mrf.mxu0 }
 0x32b   : > { %v1059_v37 = vpop.f32.mrf.mxu0 }
 0x398   : > { %v755_v38 = vpop.permute.xlu0 %754 }
 0x399   : > { %v757_v39 = vsel %vm426_vm1, %v676_v36, %v755_v38 }
 0x39a   : > { %759 = vst.msk [vmem:[%s405_s30] sm:$0xff] %vm758_vm4, %v757_v39 }
 0x39b   : > { %1313 = shalt.err (!%p1310_p1)
}
 0x39c   : > { %s1314_s18 = scalar_lea.hbm %s1680_s1, 128  ;;  %s1318_s27 = scalar_lea.hbm %s1751_s11, 256 }
 0x39d   : > { %p1315_p2 = scmp.ne.s32.totalorder %s1680_s1, %s1314_s18  ;;  %p1319_p8 = scmp.lt.s32.totalorder %s1680_s1, %s1751_s11 }
 0x39e   : > { %p1320_p0 = scmp.lt.s32.totalorder %s1318_s27, %s1314_s18 }
 0x39f   : > { %p1316_p5 = pnand %p1315_p2, %p1492_p9 }
 0x3a0   : > { %p1321_p3 = por %p1320_p0, %p1319_p8 }
 0x3a1   : > { %p1317_p6 = pneg %p1316_p5 }
 0x3a3   : > { %p1322_p4 = pnand %p1321_p3, %p1317_p6 }
 0x3a5   : > { %1325 = shalt.err (!%p1322_p4)
}
 0x3a6   : > { %1073 = dma.vmem_to_hbm [thread:$0]  (%p1492_p9), %s784_s7, 128, %s1680_s1, %s763_s25  }
 0x3a7 PF: > { %s1752_s26 = sld [smem:[#allocation18_spill]]  ;;  %p1754_p7 = scmp.ge.s32.totalorder %s1392_s23, 2 }
 0x3a9   : > { %p1091_p10 = pnand %p1754_p7, %p1499_p11 }
 0x3ab   : > { %p1092_p13 = pneg %p1091_p10 }
 0x3ad   : > { %s814_s28 = sand.u32 1, %s1752_s26  }
 0x3ae   : > { %s815_s10 = scalar_lea.sflag [#allocation4], %s814_s28 }
 0x3af   : > { %1363 = dma.done.wait (%p1092_p13), %s815_s10, 128  }
 0x3b0   : > { %1365 = vsyncadd (%p1092_p13), %s815_s10, 4294967168  ;;  %s824_s29 = scalar_lea.sflag [#allocation12], %s814_s28 }
 0x3b1   : > { %1367 = dma.done.wait (%p1092_p13), %s824_s29, 256  }
 0x3b2   : > { %1369 = vsyncadd (%p1092_p13), %s824_s29, 4294967040  ;;  %s31_s23 = sadd.s32 1, %s1392_s23   ;;  %s1755_s6 = sld [smem:[#allocation19_spill]] }
 0x3b3   : > { %p28_p12 = scmp.ge.s32.totalorder %s31_s23, 4   ;;  %s1756_s20 = sld [smem:[#allocation21_spill]] }
 0x3b4   : > { %s1757_s24 = sld [smem:[#allocation20_spill]]  ;;  %s1758_s18 = smov %s1376_s19 }
 0x3b5   : > { %s1760_s21 = smov %s1388_s22 }
 0x3b6   :  { %30 = sbr.rel (!%p28_p12) target bundleno = 15 (0xf), region = 135 }
 0x3b8   : > { %s1759_s19 = smov %s1755_s6 }
 0x3ba   : > { %s1761_s22 = smov %s1757_s24 }
 0x3bb   :  { %829 = vsyncpa [#allocation3], 1 }
 0x3bc   :  { %831 = vsyncpa [#allocation3 + $0x1], 1 }
 0x3bd   :  { %832 = vsyncpa [#allocation6], 1 }
 0x3be   :  { %834 = vsyncpa [#allocation6 + $0x1], 1 }
 0x3bf   :  { %835 = vsyncpa [#allocation9], 1 }
 0x3c0   :  { %837 = vsyncpa [#allocation9 + $0x1], 1 }
 0x3c1   :  { %838 = vsyncpa [#allocation4], 1 }
 0x3c2   :  { %840 = vsyncpa [#allocation4 + $0x1], 1 }
 0x3c3   :  { %841 = vsyncpa [#allocation12], 1 }
 0x3c4   :  { %843 = vsyncpa [#allocation12 + $0x1], 1 }

// kernel: tpu_custom_call.1
= control target key start
LH: loop header
LB: loop body
LE: loop exit
PB: predicated region body
PF: predicated region fallthrough
CT: control target
= control target key end

     0   :  { %s1723_s0 = inlined_call_operand.hbm [shape: f32[2,2,8,16], index: 0, kind: input, shape index: {}]   ;;  %s1724_s1 = inlined_call_operand.hbm [shape: f32[2,2,8,16], index: 1, kind: input, shape index: {}]   ;;  %s1725_s2 = inlined_call_operand.hbm [shape: f32[2,2,8,16], index: 2, kind: input, shape index: {}]   ;;  %s1726_s3 = inlined_call_operand.hbm [shape: s32[2,1,8,8], index: 3, kind: input, shape index: {}]   ;;  %s1727_s4 = inlined_call_operand.hbm [shape: f32[2,1,8,32], index: 4, kind: output, shape index: {0}]   ;;  %s1728_s5 = inlined_call_operand.hbm [shape: f32[2,2,8,8], index: 5, kind: output, shape index: {1}]  }
   0x1   :  { %1736 = sst [smem:[#allocation23_spill]] %s1724_s1 }
   0x2   :  { %1737 = sst [smem:[#allocation24_spill]] %s1727_s4 }
   0x3   :  { %11 = vsyncpa [#allocation3], 0 }
   0x4   :  { %13 = vsyncpa [#allocation3 + $0x1], 0 }
   0x5   :  { %14 = vsyncpa [#allocation6], 0 }
   0x6   :  { %16 = vsyncpa [#allocation6 + $0x1], 0 }
   0x7   :  { %17 = vsyncpa [#allocation9], 0 }
   0x8   :  { %19 = vsyncpa [#allocation9 + $0x1], 0 }
   0x9   :  { %20 = vsyncpa [#allocation4], 0 }
   0xa   :  { %22 = vsyncpa [#allocation4 + $0x1], 0 }
   0xb   :  { %23 = vsyncpa [#allocation12], 0 }
   0xc   :  { %25 = vsyncpa [#allocation12 + $0x1], 0  ;;  %s1437_s18 = smov 0   ;;  %s1439_s19 = smov 0  }
   0xd   :  { %s1441_s20 = smov 0   ;;  %s1443_s21 = smov 0  }
   0xe   :  { %s1445_s22 = smov 0   ;;  %s1447_s23 = smov 0  }
   0xf LB: > { %1738 = sst [smem:[#allocation18_spill]] %s1372_s18  ;;  %s1468_s24 = sadd.s32 4294967295, %s1392_s23   ;;  %s1392_s23 = sphi %s1447_s23, %s31_s23   ;;  %s1388_s22 = sphi %s1445_s22, %s1761_s22   ;;  %s1384_s21 = sphi %s1443_s21, %s1760_s21   ;;  %s1380_s20 = sphi %s1441_s20, %s1756_s20   ;;  %s1376_s19 = sphi %s1439_s19, %s1759_s19   ;;  %s1372_s18 = sphi %s1437_s18, %s1758_s18  }
  0x10   : > { %1739 = sst [smem:[#allocation19_spill]] %s1380_s20  ;;  %s999_s25 = sadd.s32 4294967294, %s1392_s23  }
  0x11   : > { %s50_s26 = sadd.s32 1, %s1388_s22  ;;  %s61_s27 = sadd.s32 1, %s1380_s20 }
  0x12   : > { %p52_p0 = scmp.ge.s32.totalorder %s50_s26, 2  ;;  %p68_p1 = scmp.ne.s32.totalorder %s1380_s20, %s1376_s19 }
  0x13   : > { %p69_p2 = scmp.eq.s32.totalorder %s1392_s23, 0  ;;  %p74_p3 = scmp.ne.s32.totalorder %s1376_s19, %s1372_s18 }
  0x14   : > { %s1763_s26 = smov (%p52_p0, %s50_s26), 0  ;;  %p75_p5 = scmp.eq.s32.totalorder %s1468_s24, 0 }
  0x15   : > { %1740 = sst [smem:[#allocation20_spill]] %s1763_s26  ;;  %p1480_p4 = por %p69_p2, %p68_p1 }
  0x16   : > { %s54_s29 = ssub.s32 %s1388_s22, %s1763_s26  ;;  %p186_p6 = scmp.eq.s32.totalorder %s1468_s24, 1 }
  0x17   : > { %p59_p7 = scmp.eq.s32.totalorder %s54_s29, 0  ;;  %p1488_p8 = por %p75_p5, %p74_p3 }
  0x18   : > { %p1492_p9 = por %p186_p6, %p68_p1  ;;  %p192_p10 = scmp.eq.s32.totalorder %s999_s25, 1 }
  0x19   : > { %s1497_s7 = scalar_select %p59_p7, %s1380_s20, %s61_s27  }
  0x1a   : > { %p1499_p11 = por %p192_p10, %p74_p3  ;;  %p1097_p13 = scmp.lt.s32.totalorder %s1392_s23, 2 }
  0x1b   : > { %1744 = sst [smem:[#allocation21_spill]] %s1497_s7  ;;  %s1506_s9 = sand.u32 1, %s1380_s20  }
  0x1c   : > { %s1745_s8 = scalar_select %p1499_p11, 1, 0 }
  0x1d   : > { %s1509_s10 = sshll.u32 %s1506_s9, 4  ;;  %s1512_s11 = sshll.u32 %s1388_s22, 8 }
  0x1e   : > { %1746 = sst [smem:[#allocation22_spill]] %s1745_s8  ;;  %p1516_p0 = pnand %p1097_p13, %p1480_p4 }
  0x1f   : > { %s266_s13 = sand.u32 1, %s1392_s23   ;;  %s1748_s1 = sld [smem:[#allocation23_spill]] }
  0x20   : > { %s270_s17 = scalar_lea.vmem [#allocation5], %s1509_s10  ;;  %p1013_p1 = scmp.ge.s32.totalorder %s1392_s23, 1 }
  0x21   : > { %s279_s25 = sshll.u32 %s270_s17, 4  ;;  %p329_p2 = scmp.lt.s32.totalorder %s1392_s23, 3  ;;  %s280_s25 = int_to_ptr.vmem [resolvable:$true] %s279_s25 }
  0x22   : > { %s1528_s27 = scalar_lea.sflag [#allocation6], %s266_s13  ;;  %p1164_p3 = pneg %p1516_p0 }
  0x23   : > { %s1175_s28 = scalar_lea.vmem %s280_s25, 256  ;;  %s1394_s29 = smov [#allocation5]  }
  0x24   : > { %p1176_p4 = scmp.ne.s32.totalorder %s280_s25, %s1175_s28  ;;  %s1180_s26 = sshll.u32 %s1394_s29, 4  ;;  %s1181_s26 = int_to_ptr.vmem [resolvable:$false] %s1180_s26 }
  0x25   : > { %s278_s16 = scalar_lea.hbm %s1748_s1, %s1512_s11  ;;  %s1182_s14 = scalar_lea.vmem %s1181_s26, 512 }
  0x26   : > { %p1178_p5 = pnand %p1176_p4, %p1164_p3  ;;  %p1183_p7 = scmp.lt.s32.totalorder %s280_s25, %s1181_s26 }
  0x27   : > { %p1184_p10 = scmp.lt.s32.totalorder %s1182_s14, %s1175_s28 }
  0x28   : > { %p1179_p6 = pneg %p1178_p5 }
  0x29   : > { %p1185_p13 = por %p1184_p10, %p1183_p7 }
  0x2b   : > { %p1186_p12 = pnand %p1185_p13, %p1179_p6 }
  0x2d   : > { %1189 = shalt.err (!%p1186_p12)
}
  0x2e   : > { %s1734_s15 = smov 128   ;;  %s1396_s13 = smov 8  }
  0x2f   : > { %1083 = dma.hbm_to_vmem [thread:$0]  (!%p1516_p0), %s278_s16, 256, %s280_s25, %s1528_s27, %s1734_s15, %s1734_s15, %s1396_s13  }
  0x30   : > { %p1545_p4 = pnand %p1013_p1, %p329_p2  ;;  %s255_s29 = scalar_lea.hbm %s1723_s0, %s1512_s11 }
  0x31   : > { %s246_s14 = scalar_lea.vmem [#allocation2], %s1509_s10  ;;  %s301_s8 = scalar_lea.hbm %s1725_s2, %s1512_s11 }
  0x32   : > { %s256_s1 = sshll.u32 %s246_s14, 4  ;;  %s243_s18 = scalar_lea.sflag [#allocation3], %s1506_s9  ;;  %s257_s1 = int_to_ptr.vmem [resolvable:$true] %s256_s1 }
  0x33   : > { %s1203_s4 = scalar_lea.vmem %s257_s1, 256  ;;  %s1397_s16 = smov [#allocation2]  }
  0x34   : > { %p1204_p12 = scmp.ne.s32.totalorder %s257_s1, %s1203_s4  ;;  %s1208_s25 = sshll.u32 %s1397_s16, 4  ;;  %s1209_s25 = int_to_ptr.vmem [resolvable:$false] %s1208_s25 }
  0x35   : > { %s1210_s15 = scalar_lea.vmem %s1209_s25, 512  ;;  %p1211_p5 = scmp.lt.s32.totalorder %s257_s1, %s1209_s25 }
  0x36   : > { %p1206_p1 = pnand %p1204_p12, %p1164_p3  ;;  %p1212_p6 = scmp.lt.s32.totalorder %s1210_s15, %s1203_s4 }
  0x38   : > { %p1207_p2 = pneg %p1206_p1  ;;  %p1213_p7 = por %p1212_p6, %p1211_p5 }
  0x3a   : > { %p1214_p10 = pnand %p1213_p7, %p1207_p2 }
  0x3c   : > { %1217 = shalt.err (!%p1214_p10)
}
  0x3d   : > { %s1750_s20 = smov 128   ;;  %s293_s7 = scalar_lea.vmem [#allocation7], %s1509_s10 }
  0x3e   : > { %1080 = dma.hbm_to_vmem [thread:$0]  (!%p1516_p0), %s255_s29, 256, %s257_s1, %s243_s18, %s1750_s20, %s1750_s20, %s1396_s13  }
  0x3f   : > { %s302_s17 = sshll.u32 %s293_s7, 4  ;;  %s1011_s28 = sshll.u32 %s1506_s9, 3  ;;  %s303_s17 = int_to_ptr.vmem [resolvable:$true] %s302_s17 }
  0x40   : > { %s1231_s14 = scalar_lea.vmem %s303_s17, 256  ;;  %s1398_s4 = smov [#allocation7]  }
  0x41   : > { %p1232_p13 = scmp.ne.s32.totalorder %s303_s17, %s1231_s14  ;;  %s1236_s15 = sshll.u32 %s1398_s4, 4  ;;  %s1237_s15 = int_to_ptr.vmem [resolvable:$false] %s1236_s15 }
  0x42   : > { %s1238_s16 = scalar_lea.vmem %s1237_s15, 512  ;;  %p1239_p2 = scmp.lt.s32.totalorder %s303_s17, %s1237_s15 }
  0x43   : > { %p1234_p12 = pnand %p1232_p13, %p1164_p3  ;;  %p1240_p5 = scmp.lt.s32.totalorder %s1238_s16, %s1231_s14 }
  0x45   : > { %p1235_p1 = pneg %p1234_p12  ;;  %p1241_p6 = por %p1240_p5, %p1239_p2 }
  0x47   : > { %p1242_p7 = pnand %p1241_p6, %p1235_p1 }
  0x49   : > { %1245 = shalt.err (!%p1242_p7)
}
  0x4a   : > { %1086 = dma.hbm_to_vmem [thread:$0]  (!%p1516_p0), %s301_s8, 256, %s303_s17, %s1528_s27, %s1750_s20, %s1750_s20, %s1396_s13  }
  0x4b   : > { %s1012_s10 = sshll.u32 %s1388_s22, 7  ;;  %s316_s14 = scalar_lea.vmem [#allocation8], %s1011_s28 }
  0x4c   : > { %s322_s7 = scalar_lea.hbm %s1726_s3, %s1012_s10  ;;  %s324_s4 = sshll.u32 %s316_s14, 4  ;;  %s325_s4 = int_to_ptr.vmem [resolvable:$true] %s324_s4 }
  0x4d   : > { %s313_s15 = scalar_lea.sflag [#allocation9], %s1506_s9  ;;  %s1259_s16 = scalar_lea.vmem %s325_s4, 128 }
  0x4e   : > { %p1260_p10 = scmp.ne.s32.totalorder %s325_s4, %s1259_s16  ;;  %s1399_s11 = smov [#allocation8]  }
  0x4f   : > { %s1264_s1 = sshll.u32 %s1399_s11, 4  ;;  %s1265_s1 = int_to_ptr.vmem [resolvable:$false] %s1264_s1 }
  0x50   : > { %p1262_p13 = pnand %p1260_p10, %p1164_p3  ;;  %s1266_s18 = scalar_lea.vmem %s1265_s1, 256 }
  0x51   : > { %p1267_p1 = scmp.lt.s32.totalorder %s325_s4, %s1265_s1  ;;  %p1268_p2 = scmp.lt.s32.totalorder %s1266_s18, %s1259_s16 }
  0x52   : > { %p1263_p12 = pneg %p1262_p13 }
  0x53   : > { %p1269_p5 = por %p1268_p2, %p1267_p1 }
  0x55   : > { %p1270_p6 = pnand %p1269_p5, %p1263_p12 }
  0x57   : > { %1273 = shalt.err (!%p1270_p6)
}
  0x58   : > { %1089 = dma.hbm_to_vmem [thread:$0]  (!%p1516_p0), %s322_s7, 128, %s325_s4, %s313_s15  }
  0x59   : > { %333 = sbr.rel (%p1545_p4) target bundleno = 934 (0x3a6), region = 36  ;;  %s1596_s8 = sand.u32 (!%p1545_p4), 1, %s1376_s19  }
  0x5a   : > { %s1599_s9 = sshll.u32 (!%p1545_p4), %s1596_s8, 4  ;;  %s336_s27 = scalar_lea.sflag (!%p1545_p4), [#allocation3], %s1596_s8 }
  0x5b   : > { %s339_s13 = scalar_lea.vmem (!%p1545_p4), [#allocation2], %s1599_s9 }
  0x5e   : > { %1351 = dma.done.wait (%p1488_p8), %s336_s27, 256  }
  0x5f   : > { %1353 = vsyncadd (%p1488_p8), %s336_s27, 4294967040  ;;  %s344_s12 = sand.u32 1, %s1468_s24   ;;  %s348_s20 = scalar_lea.vmem [#allocation5], %s1599_s9 }
  0x60   : > { %s345_s26 = scalar_lea.sflag [#allocation6], %s344_s12 }
  0x61   : > { %1355 = dma.done.wait (%p1488_p8), %s345_s26, 512  }
  0x62   : > { %1357 = vsyncadd (%p1488_p8), %s345_s26, 4294966784  ;;  %s1017_s17 = sshll.u32 %s1596_s8, 3  ;;  %s357_s28 = scalar_lea.vmem [#allocation7], %s1599_s9 }
  0x63   : > { %s363_s10 = scalar_lea.sflag [#allocation9], %s1596_s8  ;;  %s366_s29 = scalar_lea.vmem [#allocation8], %s1017_s17 }
  0x64   : > { %1359 = dma.done.wait (%p1488_p8), %s363_s10, 128  }
  0x65   : > { %1361 = vsyncadd (%p1488_p8), %s363_s10, 4294967168  ;;  %v1400_v0 = vmov 0.0   ;;  %vm1401_vm0 = vmmov 0   ;;  %vm426_vm1 = vcmask 130048   ;;  %v420_v1 = vld [vmem:[%s348_s20 + $0x8] sm:$0xff]  ;;  %v419_v3 = vld [vmem:[%s348_s20] sm:$0xff] }
  0x66   : > { %1050 = vmatprep.subr.mxu1 %v1400_v0  ;;  %1052 = vmatprep.mubr.msk.f32.mxu1 %vm1401_vm0, %v1400_v0  ;;  %v418_v2 = vld [vmem:[%s339_s13 + $0x8] sm:$0xff]  ;;  %v417_v5 = vld [vmem:[%s339_s13] sm:$0xff]  ;;  %vm584_vm3 = vcmask 64512   ;;  %s412_s24 = scalar_lea.vmem [#allocation11], %s1599_s9  ;;  %s1036_s30 = sshll.u32 %s1384_s21, 8 }
  0x67   : > { %1045 = vmatprep.subr.mxu0 %v1400_v0  ;;  %1047 = vmatprep.mubr.msk.f32.mxu0 %vm1401_vm0, %v1400_v0  ;;  %v425_v4 = vmul.f32 0.25, %v418_v2  ;;  %v424_v6 = vmul.f32 0.25, %v417_v5  ;;  %v423_v7 = vld [vmem:[%s366_s29] sm:$0xff]  ;;  %v422_v26 = vld [vmem:[%s357_s28 + $0x8] sm:$0xff]  ;;  %s799_s25 = sshll.u32 %s412_s24, 4  ;;  %s1647_s4 = scalar_lea.hbm %s1728_s5, %s1036_s30  ;;  %s1649_s25 = int_to_ptr.vmem [resolvable:$true] %s799_s25 }
  0x68   : > { %1051 = vmatpush3.xpose.msk.msra.mxu1 %vm426_vm1, %v420_v1  ;;  %1046 = vmatpush3.xpose.msk.msra.mxu0 %vm426_vm1, %v419_v3  ;;  %vm579_vm2 = vcmp.ne.s32.totalorder %v423_v7, 0  ;;  %v421_v27 = vld [vmem:[%s357_s28] sm:$0xff]  ;;  %s768_s15 = scalar_lea.sflag [#allocation12], %s1596_s8  ;;  %s1274_s16 = scalar_lea.vmem %s1649_s25, 256 }
  0x69   : > { %1060 = vmatprep.subr.mxu1 %v1400_v0  ;;  %1055 = vmatprep.subr.mxu0 %v1400_v0  ;;  %p1275_p8 = scmp.ne.s32.totalorder %s1649_s25, %s1274_s16  ;;  %s1402_s11 = smov [#allocation11]  }
  0x6a   : > { %s1278_s1 = sshll.u32 %s1402_s11, 4  ;;  %s1279_s1 = int_to_ptr.vmem [resolvable:$false] %s1278_s1 }
  0x6b   : > { %1053 = vmatmul.mubr.msk.f32.vlgmr.msra.gmra.mxu1 %vm426_vm1, %v425_v4  ;;  %1048 = vmatmul.mubr.msk.f32.vlgmr.msra.gmra.mxu0 %vm426_vm1, %v424_v6  ;;  %p1276_p0 = pnand %p1275_p8, %p1492_p9  ;;  %s1280_s18 = scalar_lea.vmem %s1279_s1, 512 }
  0x6c   : > { %1062 = vmatprep.mubr.msk.f32.mxu1 %vm1401_vm0, %v1400_v0  ;;  %1057 = vmatprep.mubr.msk.f32.mxu0 %vm1401_vm0, %v1400_v0  ;;  %p1281_p4 = scmp.lt.s32.totalorder %s1649_s25, %s1279_s1  ;;  %p1282_p7 = scmp.lt.s32.totalorder %s1280_s18, %s1274_s16 }
  0x6d   : > { %1061 = vmatpush3.msra.mxu1 %v422_v26  ;;  %1056 = vmatpush3.msra.mxu0 %v421_v27  ;;  %p1277_p3 = pneg %p1276_p0 }
  0x6e   : > { %p1283_p10 = por %p1282_p7, %p1281_p4 }
  0x70   : > { %p1284_p13 = pnand %p1283_p10, %p1277_p3 }
 0x12b   : > { %v575_v8 = vpop.f32.mrf.mxu1  ;;  %v499_v9 = vpop.f32.mrf.mxu0 }
 0x12c   : > { %v583_v10 = vsel %vm579_vm2, -1e+09, %v575_v8  ;;  %v582_v11 = vsel %vm579_vm2, -1e+09, %v499_v9 }
 0x12d   : > { %v1054_v12 = vpop.f32.mrf.mxu1  ;;  %v588_v13 = vsel %vm584_vm3, %v583_v10, -inf  ;;  %v1049_v14 = vpop.f32.mrf.mxu0  ;;  %v585_v15 = vsel %vm584_vm3, %v582_v11, -inf }
 0x12e   : > { %589 = vmax.xlane.f32.xlu0 %v588_v13 }
 0x132   : > { %586 = vmax.xlane.f32.xlu0 %v585_v15 }
 0x1b7   : > { %v590_v16 = vpop.xlane.xlu0 %589 }
 0x1b8   : > { %v592_v17 = vsub.f32 %v583_v10, %v590_v16 }
 0x1ba   : > { %v595_v18 = vmul.f32 1.442695, %v592_v17 }
 0x1bb   : > { %v587_v19 = vpop.xlane.xlu0 %586 }
 0x1bc   : > { %1154 = vpow2.f32 %v595_v18  ;;  %v591_v20 = vsub.f32 %v582_v11, %v587_v19 }
 0x1be   : > { %v593_v21 = vmul.f32 1.442695, %v591_v20 }
 0x1c0   : > { %1156 = vpow2.f32 %v593_v21 }
 0x1c9   : > { %v1155_v22 = vpop.eup %1154 }
 0x1ca   : > { %v600_v23 = vsel %vm584_vm3, %v1155_v22, 0.0 }
 0x1cb   : > { %601 = vadd.xlane.f32.xlu1 %v600_v23 }
 0x1cd   : > { %v1157_v24 = vpop.eup %1156 }
 0x1ce   : > { %v597_v25 = vsel %vm584_vm3, %v1157_v24, 0.0 }
 0x1cf   : > { %598 = vadd.xlane.f32.xlu1 %v597_v25 }
 0x254   : > { %v602_v28 = vpop.xlane.xlu1 %601 }
 0x255   : > { %1158 = vrcp.f32 %v602_v28 }
 0x258   : > { %v599_v29 = vpop.xlane.xlu1 %598 }
 0x259   : > { %1160 = vrcp.f32 %v599_v29 }
 0x262   : > { %v1159_v30 = vpop.eup %1158 }
 0x263   : > { %v606_v31 = vmul.f32 %v1159_v30, %v1155_v22 }
 0x265   : > { %1063 = vmatmul.mubr.msk.f32.vlgmr.msra.gmra.mxu1 %vm584_vm3, %v606_v31  ;;  %761 = vst.msk [vmem:[%s412_s24 + $0x8] sm:$0xff] %vm584_vm3, %v606_v31 }
 0x266   : > { %v1161_v32 = vpop.eup %1160 }
 0x267   : > { %v605_v33 = vmul.f32 %v1161_v32, %v1157_v24 }
 0x269   : > { %1058 = vmatmul.mubr.msk.f32.vlgmr.msra.gmra.mxu0 %vm584_vm3, %v605_v33  ;;  %760 = vst.msk [vmem:[%s412_s24] sm:$0xff] %vm584_vm3, %v605_v33 }
 0x26a   : > { %1287 = shalt.err (!%p1284_p13)
}
 0x26b   : > { %s1288_s9 = scalar_lea.hbm %s1647_s4, 256  ;;  %s1292_s12 = scalar_lea.hbm %s1728_s5, 512 }
 0x26c   : > { %p1289_p12 = scmp.ne.s32.totalorder %s1647_s4, %s1288_s9  ;;  %p1293_p5 = scmp.lt.s32.totalorder %s1647_s4, %s1728_s5 }
 0x26d   : > { %p1294_p6 = scmp.lt.s32.totalorder %s1292_s12, %s1288_s9 }
 0x26e   : > { %p1290_p1 = pnand %p1289_p12, %p1492_p9 }
 0x26f   : > { %p1295_p8 = por %p1294_p6, %p1293_p5 }
 0x270   : > { %p1291_p2 = pneg %p1290_p1 }
 0x272   : > { %p1296_p0 = pnand %p1295_p8, %p1291_p2 }
 0x274   : > { %1299 = shalt.err (!%p1296_p0)
}
 0x275   : > { %s1403_s28 = smov 128   ;;  %s1404_s10 = smov 8   ;;  %vm758_vm4 = vcmask 261248  }
 0x276   : > { %1074 = dma.vmem_to_hbm [thread:$0]  (%p1492_p9), %s1649_s25, 256, %s1647_s4, %s768_s15, %s1403_s28, %s1403_s28, %s1404_s10  }
 0x277   : > { %s1405_s29 = smov 16   ;;  %s405_s24 = scalar_lea.vmem [#allocation10], %s1017_s17 }
 0x278   : > { %s1028_s30 = sshll.u32 %s1384_s21, 7  ;;  %s783_s7 = sshll.u32 %s405_s24, 4  ;;  %s784_s7 = int_to_ptr.vmem [resolvable:$true] %s783_s7 }
 0x279   : > { %s1751_s11 = sld [smem:[#allocation24_spill]]  ;;  %s763_s25 = scalar_lea.sflag [#allocation4], %s1596_s8 }
 0x27a   : > { %s1300_s4 = scalar_lea.vmem %s784_s7, 128  ;;  %s1406_s17 = smov [#allocation10]  }
 0x27b   : > { %p1301_p3 = scmp.ne.s32.totalorder %s784_s7, %s1300_s4  ;;  %s1304_s15 = sshll.u32 %s1406_s17, 4  ;;  %s1305_s15 = int_to_ptr.vmem [resolvable:$false] %s1304_s15 }
 0x27c   : > { %s1306_s21 = scalar_lea.vmem %s1305_s15, 256  ;;  %p1307_p10 = scmp.lt.s32.totalorder %s784_s7, %s1305_s15 }
 0x27d   : > { %p1302_p4 = pnand %p1301_p3, %p1492_p9  ;;  %p1308_p13 = scmp.lt.s32.totalorder %s1306_s21, %s1300_s4 }
 0x27f   : > { %s1681_s1 = scalar_lea.hbm %s1751_s11, %s1028_s30  ;;  %p1303_p7 = pneg %p1302_p4 }
 0x280   : > { %p1309_p12 = por %p1308_p13, %p1307_p10 }
 0x282   : > { %p1310_p1 = pnand %p1309_p12, %p1303_p7 }
 0x325   : > { %v749_v34 = vpop.f32.mrf.mxu1 }
 0x326   : > { %755 = vrot.lane.b32.xlu0 %v749_v34, %s1405_s29 }
 0x327   : > { %v1064_v35 = vpop.f32.mrf.mxu1 }
 0x329   : > { %v676_v36 = vpop.f32.mrf.mxu0 }
 0x32a   : > { %753 = vst.msk [vmem:[%s405_s24] sm:$0xff] %vm426_vm1, %v676_v36 }
 0x32b   : > { %v1059_v37 = vpop.f32.mrf.mxu0 }
 0x398   : > { %v756_v38 = vpop.permute.xlu0 %755 }
 0x399   : > { %759 = vst.msk [vmem:[%s405_s24] sm:$0xff] %vm758_vm4, %v756_v38 }
 0x39a   : > { %1313 = shalt.err (!%p1310_p1)
}
 0x39b   : > { %s1314_s18 = scalar_lea.hbm %s1681_s1, 128  ;;  %s1318_s27 = scalar_lea.hbm %s1751_s11, 256 }
 0x39c   : > { %p1315_p2 = scmp.ne.s32.totalorder %s1681_s1, %s1314_s18  ;;  %p1319_p8 = scmp.lt.s32.totalorder %s1681_s1, %s1751_s11 }
 0x39d   : > { %p1320_p0 = scmp.lt.s32.totalorder %s1318_s27, %s1314_s18 }
 0x39e   : > { %p1316_p5 = pnand %p1315_p2, %p1492_p9 }
 0x39f   : > { %p1321_p3 = por %p1320_p0, %p1319_p8 }
 0x3a0   : > { %p1317_p6 = pneg %p1316_p5 }
 0x3a2   : > { %p1322_p4 = pnand %p1321_p3, %p1317_p6 }
 0x3a4   : > { %1325 = shalt.err (!%p1322_p4)
}
 0x3a5   : > { %1073 = dma.vmem_to_hbm [thread:$0]  (%p1492_p9), %s784_s7, 128, %s1681_s1, %s763_s25  }
 0x3a6 PF: > { %s1752_s26 = sld [smem:[#allocation18_spill]]  ;;  %p1754_p7 = scmp.ge.s32.totalorder %s1392_s23, 2 }
 0x3a8   : > { %p1091_p10 = pnand %p1754_p7, %p1499_p11 }
 0x3aa   : > { %p1092_p13 = pneg %p1091_p10 }
 0x3ac   : > { %s814_s28 = sand.u32 1, %s1752_s26  }
 0x3ad   : > { %s815_s10 = scalar_lea.sflag [#allocation4], %s814_s28 }
 0x3ae   : > { %1363 = dma.done.wait (%p1092_p13), %s815_s10, 128  }
 0x3af   : > { %1365 = vsyncadd (%p1092_p13), %s815_s10, 4294967168  ;;  %s824_s29 = scalar_lea.sflag [#allocation12], %s814_s28 }
 0x3b0   : > { %1367 = dma.done.wait (%p1092_p13), %s824_s29, 256  }
 0x3b1   : > { %1369 = vsyncadd (%p1092_p13), %s824_s29, 4294967040  ;;  %s31_s23 = sadd.s32 1, %s1392_s23   ;;  %s1755_s6 = sld [smem:[#allocation19_spill]] }
 0x3b2   : > { %p28_p12 = scmp.ge.s32.totalorder %s31_s23, 4   ;;  %s1756_s20 = sld [smem:[#allocation21_spill]] }
 0x3b3   : > { %s1757_s24 = sld [smem:[#allocation20_spill]]  ;;  %s1758_s18 = smov %s1376_s19 }
 0x3b4   : > { %s1760_s21 = smov %s1388_s22 }
 0x3b5   :  { %30 = sbr.rel (!%p28_p12) target bundleno = 15 (0xf), region = 135 }
 0x3b7   : > { %s1759_s19 = smov %s1755_s6 }
 0x3b9   : > { %s1761_s22 = smov %s1757_s24 }
 0x3ba   :  { %829 = vsyncpa [#allocation3], 1 }
 0x3bb   :  { %831 = vsyncpa [#allocation3 + $0x1], 1 }
 0x3bc   :  { %832 = vsyncpa [#allocation6], 1 }
 0x3bd   :  { %834 = vsyncpa [#allocation6 + $0x1], 1 }
 0x3be   :  { %835 = vsyncpa [#allocation9], 1 }
 0x3bf   :  { %837 = vsyncpa [#allocation9 + $0x1], 1 }
 0x3c0   :  { %838 = vsyncpa [#allocation4], 1 }
 0x3c1   :  { %840 = vsyncpa [#allocation4 + $0x1], 1 }
 0x3c2   :  { %841 = vsyncpa [#allocation12], 1 }
 0x3c3   :  { %843 = vsyncpa [#allocation12 + $0x1], 1 }

</bundles_post_ra>
